<compile_context>
chip_gen: v6e
topology: v6e:2x2x1
jax: 0.10.0
libtpu: 0.0.40
codegen_flags: <defaults>
</compile_context>

<pallas_src>
import numpy as np
import jax
import jax.numpy as jnp
from jax import lax
from jax.experimental import pallas as pl
from jax.experimental.pallas import tpu as pltpu


def _bilstm_tagger_kernel(xg_ref, sel_ref, mout_ref, whh_ref, wout_ref, bout_ref,
                          out_ref, hf_seq, hb_seq):
    """Fused bidirectional-LSTM tagger hot path.

    xg_ref:   (T, B, 4GW)  per-STEP gate pre-activations (input proj + biases);
                           fwd lanes come from time s, bwd lanes from time T-1-s
    sel_ref:  (T, B, GW)   per-step state-update mask (fwd lanes 1, bwd lanes
                           = validity of time T-1-s, pad lanes 1)
    mout_ref: (T, B, 1)    output mask (1 valid, 0 PAD), normal time order
    whh_ref:  (GW, 4GW)    packed recurrent weights (rows 0:H fwd, H:2H bwd)
    wout_ref: (H, NTpad)   output Linear weight^T, zero-padded to 128 lanes
    bout_ref: (1, NTpad)
    out_ref:  (T, B, NTpad)
    hf_seq, hb_seq: (T, B, GW) write-once scratch (h stored at fwd / bwd index)
    """
    T, B, GW = sel_ref.shape
    H = wout_ref.shape[0]
    nt_pad = out_ref.shape[-1]
    whh = whh_ref[...]                       # hoisted out of the loop

    def step(s, carry):
        h, c = carry                         # (B, GW): lanes [0:H]=fwd, [H:2H]=bwd
        # ONE recurrent GEMM for both directions (block-structured weights).
        gates = jnp.dot(h, whh, preferred_element_type=jnp.float32) + xg_ref[s]
        # PyTorch gate order: input, forget, cell(g), output. Every slice is a
        # full 128-lane, vreg-aligned block (no lane rotates on the serial path).
        i = jax.nn.sigmoid(gates[:, 0 * GW:1 * GW])
        f = jax.nn.sigmoid(gates[:, 1 * GW:2 * GW])
        g = jnp.tanh(gates[:, 2 * GW:3 * GW])
        o = jax.nn.sigmoid(gates[:, 3 * GW:4 * GW])
        c_new = f * c + i * g
        h_new = o * jnp.tanh(c_new)
        # Packed-sequence semantics: bwd lanes frozen at PAD steps; fwd lanes
        # always update (right-padded inputs), PAD outputs zeroed after loop.
        upd = sel_ref[s] > 0.0
        h = jnp.where(upd, h_new, h)
        c = jnp.where(upd, c_new, c)
        hf_seq[s] = h                        # fwd-direction output at time s
        hb_seq[T - 1 - s] = h                # bwd-direction output at time T-1-s
        return (h, c)

    zeros = jnp.zeros((B, GW), jnp.float32)
    lax.fori_loop(0, T, step, (zeros, zeros), unroll=True)

    # Off the serial path: sum directions, zero PAD outputs (pad_packed pads
    # with zeros), then the lane-dense output Linear.
    hf = hf_seq[...][:, :, :H]
    hb = hb_seq[...][:, :, H:2 * H]
    summed = ((hf + hb) * mout_ref[...]).reshape(T * B, H)
    logits = (jnp.dot(summed, wout_ref[...], preferred_element_type=jnp.float32)
              + bout_ref[...])
    out_ref[...] = logits.reshape(T, B, nt_pad)


def pack_params(params):
    """One-time parameter packing (hoisted out of the forward path)."""
    emb = params["embedding"].astype(jnp.float32)
    E = emb.shape[1]
    H = params["whh_f"].shape[1]
    GW = max(128, ((2 * H + 127) // 128) * 128)      # padded per-gate block width
    n_tags = params["wout"].shape[0]
    nt_pad = max(128, ((n_tags + 127) // 128) * 128)

    def pack_cols(mat_f, mat_b):
        # mat_*: (X, 4H) -> (X, 4GW) with [i_f|i_b|pad | f_f|f_b|pad | ...]
        out = jnp.zeros((mat_f.shape[0], 4 * GW), jnp.float32)
        for g in range(4):
            out = out.at[:, g * GW:g * GW + H].set(mat_f[:, g * H:(g + 1) * H])
            out = out.at[:, g * GW + H:g * GW + 2 * H].set(mat_b[:, g * H:(g + 1) * H])
        return out

    wih_packed = pack_cols(params["wih_f"].T, params["wih_b"].T)           # (E, 4GW)
    b_packed = pack_cols((params["bih_f"] + params["bhh_f"])[None, :],
                         (params["bih_b"] + params["bhh_b"])[None, :])     # (1, 4GW)

    whh_packed = jnp.zeros((GW, 4 * GW), jnp.float32)
    whh_f_t, whh_b_t = params["whh_f"].T, params["whh_b"].T                # (H, 4H)
    for g in range(4):
        whh_packed = whh_packed.at[:H, g * GW:g * GW + H].set(
            whh_f_t[:, g * H:(g + 1) * H])
        whh_packed = whh_packed.at[H:2 * H, g * GW + H:g * GW + 2 * H].set(
            whh_b_t[:, g * H:(g + 1) * H])

    # Fold the input projection into the embedding: per-token, per-direction
    # gate pre-activations (biases included). K=E GEMM removed from the kernel.
    # TODO(synk): for large vocabularies keep the plain embedding + in-kernel
    # input GEMM instead (this table is 8x the embedding memory).
    gate_table = (jnp.dot(emb, wih_packed, precision=lax.Precision.HIGHEST)
                  + b_packed)                                              # (V, 4GW)

    lane_is_fwd = jnp.ones((4 * GW,), bool)
    for g in range(4):
        lane_is_fwd = lane_is_fwd.at[g * GW + H:g * GW + 2 * H].set(False)

    wout_pad = jnp.zeros((H, nt_pad), jnp.float32).at[:, :n_tags].set(params["wout"].T)
    bout_pad = jnp.zeros((1, nt_pad), jnp.float32).at[0, :n_tags].set(params["bout"])

    return {"gate_table": gate_table, "lane_is_fwd": lane_is_fwd,
            "whh": whh_packed, "wout": wout_pad, "bout": bout_pad,
            "H": H, "GW": GW, "n_tags": n_tags, "nt_pad": nt_pad}


def tagger_we_forward(form_ids, packed):
    """form_ids: int32 [B, T] (PAD id == 0)  ->  logits float32 [B, T, num_tags]."""
    H, GW = packed["H"], packed["GW"]
    n_tags, nt_pad = packed["n_tags"], packed["nt_pad"]
    B, T = form_ids.shape
    B_pad = max(8, ((B + 7) // 8) * 8)                 # sublane-dense batch

    # Batch pad with PAD-only rows (id 0); time-major for the recurrence.
    ids_p = jnp.zeros((B_pad, T), form_ids.dtype).at[:B].set(form_ids)
    ids_tm = ids_p.T                                   # (T, B_pad)
    mask_tm = (ids_tm != 0).astype(jnp.float32)        # (T, B_pad)

    # Per-step gate pre-activations: fwd lanes from time s, bwd lanes from T-1-s.
    pre = packed["gate_table"][ids_tm]                 # (T, B_pad, 4GW)
    xg_step = jnp.where(packed["lane_is_fwd"], pre, pre[::-1])

    # Per-step state-update mask: fwd lanes always update (right-padded inputs),
    # bwd lanes frozen at PAD steps; pad lanes benign.
    sel = jnp.concatenate(
        [jnp.ones((T, B_pad, H), jnp.float32),
         jnp.broadcast_to(mask_tm[::-1][:, :, None], (T, B_pad, H)),
         jnp.ones((T, B_pad, GW - 2 * H), jnp.float32)], axis=-1)
    mout = mask_tm[:, :, None]                         # (T, B_pad, 1)

    inputs = (xg_step, sel, mout, packed["whh"], packed["wout"], packed["bout"])
    vmem = pl.BlockSpec(memory_space=pltpu.MemorySpace.VMEM)

    out_tm = pl.pallas_call(
        _bilstm_tagger_kernel,
        out_shape=jax.ShapeDtypeStruct((T, B_pad, nt_pad), jnp.float32),
        in_specs=[vmem] * len(inputs),
        out_specs=vmem,
        scratch_shapes=[
            pltpu.VMEM((T, B_pad, GW), jnp.float32),   # h stored at fwd time index
            pltpu.VMEM((T, B_pad, GW), jnp.float32),   # h stored at bwd time index
        ],
    )(*inputs)

    return jnp.transpose(out_tm, (1, 0, 2))[:B, :, :n_tags]   # [B, T, n_tags]


def init_params(key, vocab_size, we_dim, rnn_dim, num_tags):
    """Deterministic Keras-style init matching TrainableModule.keras_init."""
    ks = jax.random.split(key, 6)
    xavier = jax.nn.initializers.glorot_uniform()
    orth = jax.nn.initializers.orthogonal()
    H4 = 4 * rnn_dim
    # zero bias, except LSTM forget-gate bias set to 1 (keras_init)
    lstm_bias = jnp.zeros((H4,), jnp.float32).at[rnn_dim:2 * rnn_dim].set(1.0)
    return {
        "embedding": jax.random.uniform(ks[0], (vocab_size, we_dim), jnp.float32,
                                        -0.05, 0.05),
        "wih_f": xavier(ks[1], (H4, we_dim), jnp.float32),
        "whh_f": orth(ks[2], (H4, rnn_dim), jnp.float32),
        "bih_f": lstm_bias, "bhh_f": lstm_bias,
        "wih_b": xavier(ks[3], (H4, we_dim), jnp.float32),
        "whh_b": orth(ks[4], (H4, rnn_dim), jnp.float32),
        "bih_b": lstm_bias, "bhh_b": lstm_bias,
        "wout": xavier(ks[5], (num_tags, rnn_dim), jnp.float32),
        "bout": jnp.zeros((num_tags,), jnp.float32),
    }


def reference_forward(form_ids, params):
    """Pure-JAX reference (same math, lax.scan recurrence) for correctness check."""
    emb = params["embedding"][form_ids].astype(jnp.float32)   # [B, T, E]
    mask = (form_ids != 0).astype(jnp.float32)[..., None]     # [B, T, 1]
    B, T, _ = emb.shape
    H = params["whh_f"].shape[1]
    hp = jax.lax.Precision.HIGHEST

    def run_dir(wih, whh, bih, bhh, reverse):
        def cell(carry, inp):
            h, c = carry
            x_t, m_t = inp
            gates = (jnp.dot(x_t, wih.T, precision=hp)
                     + jnp.dot(h, whh.T, precision=hp) + bih + bhh)
            i = jax.nn.sigmoid(gates[:, :H])
            f = jax.nn.sigmoid(gates[:, H:2 * H])
            g = jnp.tanh(gates[:, 2 * H:3 * H])
            o = jax.nn.sigmoid(gates[:, 3 * H:])
            c_new = f * c + i * g
            h_new = o * jnp.tanh(c_new)
            h = m_t * h_new + (1 - m_t) * h
            c = m_t * c_new + (1 - m_t) * c
            return (h, c), h * m_t
        xs = (jnp.transpose(emb, (1, 0, 2)), jnp.transpose(mask, (1, 0, 2)))
        init = (jnp.zeros((B, H), jnp.float32), jnp.zeros((B, H), jnp.float32))
        _, outs = lax.scan(cell, init, xs, reverse=reverse)
        return jnp.transpose(outs, (1, 0, 2))

    hf = run_dir(params["wih_f"], params["whh_f"], params["bih_f"], params["bhh_f"], False)
    hb = run_dir(params["wih_b"], params["whh_b"], params["bih_b"], params["bhh_b"], True)
    hidden = hf + hb
    return jnp.dot(hidden, params["wout"].T, precision=hp) + params["bout"]


if __name__ == "__main__":
    # Small shapes consistent with the module: batch=2, seq=8, we_dim=32, rnn_dim=32.
    B, T = 2, 8
    VOCAB, WE_DIM, RNN_DIM, NUM_TAGS = 100, 32, 32, 16

    key = jax.random.PRNGKey(0)
    kp, ki = jax.random.split(key)
    params = init_params(kp, VOCAB, WE_DIM, RNN_DIM, NUM_TAGS)
    packed = pack_params(params)           # one-time, outside the forward path

    form_ids = jax.random.randint(ki, (B, T), 1, VOCAB, dtype=jnp.int32)
    form_ids = form_ids.at[1, 5:].set(0)   # PAD the tail of the second sequence

    out = tagger_we_forward(form_ids, packed)
    out = jax.block_until_ready(out)
    assert out.shape == (B, T, NUM_TAGS) and out.dtype == jnp.float32

    ref = reference_forward(form_ids, params)
    np.testing.assert_allclose(np.asarray(out), np.asarray(ref), rtol=1e-2, atol=2e-3)

    print("KERNEL_OK")
</pallas_src>

<mosaic_0001>
module attributes {stable_mosaic.version = 11 : i64} {
  func.func @_bilstm_tagger_kernel(%arg0: memref<8x8x512xf32, #tpu.memory_space<vmem>>, %arg1: memref<8x8x128xf32, #tpu.memory_space<vmem>>, %arg2: memref<8x8x1xf32, #tpu.memory_space<vmem>>, %arg3: memref<128x512xf32, #tpu.memory_space<vmem>>, %arg4: memref<32x128xf32, #tpu.memory_space<vmem>>, %arg5: memref<1x128xf32, #tpu.memory_space<vmem>>, %arg6: memref<8x8x128xf32, #tpu.memory_space<vmem>>, %arg7: memref<8x8x128xf32, #tpu.memory_space<vmem>>, %arg8: memref<8x8x128xf32, #tpu.memory_space<vmem>>) attributes {dimension_semantics = [], scalar_prefetch = 0 : i64, scratch_operands = 2 : i64, tpu.core_type = #tpu.core_type<tc>} {
    %c0 = arith.constant 0 : index
    %c0_0 = arith.constant 0 : index
    %0 = vector.load %arg3[%c0, %c0_0] : memref<128x512xf32, #tpu.memory_space<vmem>>, vector<128x512xf32>
    %cst = arith.constant 0.000000e+00 : f32
    %1 = vector.broadcast %cst : f32 to vector<8x128xf32>
    %c0_i32 = arith.constant 0 : i32
    %cst_1 = arith.constant dense<0.000000e+00> : vector<8x512xf32>
    %2 = tpu.matmul %1, %0, %cst_1 {dimension_numbers = #tpu.dot_dimension_numbers<[1], [0], [0], [1], [0, 0, 1, 1], [], []>} : vector<8x128xf32>, vector<128x512xf32>, vector<8x512xf32> -> vector<8x512xf32>
    %3 = arith.index_cast %c0_i32 : i32 to index
    %c0_2 = arith.constant 0 : index
    %c0_3 = arith.constant 0 : index
    %4 = vector.load %arg0[%3, %c0_2, %c0_3] : memref<8x8x512xf32, #tpu.memory_space<vmem>>, vector<1x8x512xf32>
    %5 = vector.shape_cast %4 : vector<1x8x512xf32> to vector<8x512xf32>
    %6 = arith.addf %2, %5 : vector<8x512xf32>
    %7 = vector.extract_strided_slice %6 {offsets = [0, 0], sizes = [8, 128], strides = [1, 1]} : vector<8x512xf32> to vector<8x128xf32>
    %8 = arith.negf %7 : vector<8x128xf32>
    %9 = math.exp %8 : vector<8x128xf32>
    %cst_4 = arith.constant 1.000000e+00 : f32
    %10 = vector.broadcast %cst_4 : f32 to vector<8x128xf32>
    %11 = arith.addf %10, %9 : vector<8x128xf32>
    %12 = arith.divf %10, %11 : vector<8x128xf32>
    %13 = vector.extract_strided_slice %6 {offsets = [0, 128], sizes = [8, 128], strides = [1, 1]} : vector<8x512xf32> to vector<8x128xf32>
    %14 = arith.negf %13 : vector<8x128xf32>
    %15 = math.exp %14 : vector<8x128xf32>
    %cst_5 = arith.constant 1.000000e+00 : f32
    %16 = vector.broadcast %cst_5 : f32 to vector<8x128xf32>
    %17 = arith.addf %16, %15 : vector<8x128xf32>
    %18 = arith.divf %16, %17 : vector<8x128xf32>
    %19 = vector.extract_strided_slice %6 {offsets = [0, 256], sizes = [8, 128], strides = [1, 1]} : vector<8x512xf32> to vector<8x128xf32>
    %20 = math.tanh %19 : vector<8x128xf32>
    %21 = vector.extract_strided_slice %6 {offsets = [0, 384], sizes = [8, 128], strides = [1, 1]} : vector<8x512xf32> to vector<8x128xf32>
    %22 = arith.negf %21 : vector<8x128xf32>
    %23 = math.exp %22 : vector<8x128xf32>
    %cst_6 = arith.constant 1.000000e+00 : f32
    %24 = vector.broadcast %cst_6 : f32 to vector<8x128xf32>
    %25 = arith.addf %24, %23 : vector<8x128xf32>
    %26 = arith.divf %24, %25 : vector<8x128xf32>
    %27 = arith.mulf %18, %1 : vector<8x128xf32>
    %28 = arith.mulf %12, %20 : vector<8x128xf32>
    %29 = arith.addf %27, %28 : vector<8x128xf32>
    %30 = math.tanh %29 : vector<8x128xf32>
    %31 = arith.mulf %26, %30 : vector<8x128xf32>
    %32 = arith.index_cast %c0_i32 : i32 to index
    %c0_7 = arith.constant 0 : index
    %c0_8 = arith.constant 0 : index
    %33 = vector.load %arg1[%32, %c0_7, %c0_8] : memref<8x8x128xf32, #tpu.memory_space<vmem>>, vector<1x8x128xf32>
    %34 = vector.shape_cast %33 : vector<1x8x128xf32> to vector<8x128xf32>
    %cst_9 = arith.constant 0.000000e+00 : f32
    %35 = vector.broadcast %cst_9 : f32 to vector<8x128xf32>
    %36 = arith.cmpf ogt, %34, %35 : vector<8x128xf32>
    %37 = arith.select %36, %31, %1 : vector<8x128xi1>, vector<8x128xf32>
    %38 = arith.select %36, %29, %1 : vector<8x128xi1>, vector<8x128xf32>
    %39 = arith.index_cast %c0_i32 : i32 to index
    %c0_10 = arith.constant 0 : index
    %c0_11 = arith.constant 0 : index
    %40 = vector.load %arg7[%39, %c0_10, %c0_11] : memref<8x8x128xf32, #tpu.memory_space<vmem>>, vector<1x8x128xf32>
    %41 = vector.shape_cast %40 : vector<1x8x128xf32> to vector<8x128xf32>
    %42 = vector.shape_cast %37 : vector<8x128xf32> to vector<1x8x128xf32>
    tpu.vector_store %arg7[%39, %c0_10, %c0_11], %42 {strides = array<i32>} : memref<8x8x128xf32, #tpu.memory_space<vmem>>, vector<1x8x128xf32>,
    %c7_i32 = arith.constant 7 : i32
    %43 = arith.subi %c7_i32, %c0_i32 : i32
    %44 = arith.index_cast %43 : i32 to index
    %c0_12 = arith.constant 0 : index
    %c0_13 = arith.constant 0 : index
    %45 = vector.load %arg8[%44, %c0_12, %c0_13] : memref<8x8x128xf32, #tpu.memory_space<vmem>>, vector<1x8x128xf32>
    %46 = vector.shape_cast %45 : vector<1x8x128xf32> to vector<8x128xf32>
    %47 = vector.shape_cast %37 : vector<8x128xf32> to vector<1x8x128xf32>
    tpu.vector_store %arg8[%44, %c0_12, %c0_13], %47 {strides = array<i32>} : memref<8x8x128xf32, #tpu.memory_space<vmem>>, vector<1x8x128xf32>,
    %c1_i32 = arith.constant 1 : i32
    %cst_14 = arith.constant dense<0.000000e+00> : vector<8x512xf32>
    %48 = tpu.matmul %37, %0, %cst_14 {dimension_numbers = #tpu.dot_dimension_numbers<[1], [0], [0], [1], [0, 0, 1, 1], [], []>} : vector<8x128xf32>, vector<128x512xf32>, vector<8x512xf32> -> vector<8x512xf32>
    %49 = arith.index_cast %c1_i32 : i32 to index
    %c0_15 = arith.constant 0 : index
    %c0_16 = arith.constant 0 : index
    %50 = vector.load %arg0[%49, %c0_15, %c0_16] : memref<8x8x512xf32, #tpu.memory_space<vmem>>, vector<1x8x512xf32>
    %51 = vector.shape_cast %50 : vector<1x8x512xf32> to vector<8x512xf32>
    %52 = arith.addf %48, %51 : vector<8x512xf32>
    %53 = vector.extract_strided_slice %52 {offsets = [0, 0], sizes = [8, 128], strides = [1, 1]} : vector<8x512xf32> to vector<8x128xf32>
    %54 = arith.negf %53 : vector<8x128xf32>
    %55 = math.exp %54 : vector<8x128xf32>
    %cst_17 = arith.constant 1.000000e+00 : f32
    %56 = vector.broadcast %cst_17 : f32 to vector<8x128xf32>
    %57 = arith.addf %56, %55 : vector<8x128xf32>
    %58 = arith.divf %56, %57 : vector<8x128xf32>
    %59 = vector.extract_strided_slice %52 {offsets = [0, 128], sizes = [8, 128], strides = [1, 1]} : vector<8x512xf32> to vector<8x128xf32>
    %60 = arith.negf %59 : vector<8x128xf32>
    %61 = math.exp %60 : vector<8x128xf32>
    %cst_18 = arith.constant 1.000000e+00 : f32
    %62 = vector.broadcast %cst_18 : f32 to vector<8x128xf32>
    %63 = arith.addf %62, %61 : vector<8x128xf32>
    %64 = arith.divf %62, %63 : vector<8x128xf32>
    %65 = vector.extract_strided_slice %52 {offsets = [0, 256], sizes = [8, 128], strides = [1, 1]} : vector<8x512xf32> to vector<8x128xf32>
    %66 = math.tanh %65 : vector<8x128xf32>
    %67 = vector.extract_strided_slice %52 {offsets = [0, 384], sizes = [8, 128], strides = [1, 1]} : vector<8x512xf32> to vector<8x128xf32>
    %68 = arith.negf %67 : vector<8x128xf32>
    %69 = math.exp %68 : vector<8x128xf32>
    %cst_19 = arith.constant 1.000000e+00 : f32
    %70 = vector.broadcast %cst_19 : f32 to vector<8x128xf32>
    %71 = arith.addf %70, %69 : vector<8x128xf32>
    %72 = arith.divf %70, %71 : vector<8x128xf32>
    %73 = arith.mulf %64, %38 : vector<8x128xf32>
    %74 = arith.mulf %58, %66 : vector<8x128xf32>
    %75 = arith.addf %73, %74 : vector<8x128xf32>
    %76 = math.tanh %75 : vector<8x128xf32>
    %77 = arith.mulf %72, %76 : vector<8x128xf32>
    %78 = arith.index_cast %c1_i32 : i32 to index
    %c0_20 = arith.constant 0 : index
    %c0_21 = arith.constant 0 : index
    %79 = vector.load %arg1[%78, %c0_20, %c0_21] : memref<8x8x128xf32, #tpu.memory_space<vmem>>, vector<1x8x128xf32>
    %80 = vector.shape_cast %79 : vector<1x8x128xf32> to vector<8x128xf32>
    %cst_22 = arith.constant 0.000000e+00 : f32
    %81 = vector.broadcast %cst_22 : f32 to vector<8x128xf32>
    %82 = arith.cmpf ogt, %80, %81 : vector<8x128xf32>
    %83 = arith.select %82, %77, %37 : vector<8x128xi1>, vector<8x128xf32>
    %84 = arith.select %82, %75, %38 : vector<8x128xi1>, vector<8x128xf32>
    %85 = arith.index_cast %c1_i32 : i32 to index
    %c0_23 = arith.constant 0 : index
    %c0_24 = arith.constant 0 : index
    %86 = vector.load %arg7[%85, %c0_23, %c0_24] : memref<8x8x128xf32, #tpu.memory_space<vmem>>, vector<1x8x128xf32>
    %87 = vector.shape_cast %86 : vector<1x8x128xf32> to vector<8x128xf32>
    %88 = vector.shape_cast %83 : vector<8x128xf32> to vector<1x8x128xf32>
    tpu.vector_store %arg7[%85, %c0_23, %c0_24], %88 {strides = array<i32>} : memref<8x8x128xf32, #tpu.memory_space<vmem>>, vector<1x8x128xf32>,
    %c7_i32_25 = arith.constant 7 : i32
    %89 = arith.subi %c7_i32_25, %c1_i32 : i32
    %90 = arith.index_cast %89 : i32 to index
    %c0_26 = arith.constant 0 : index
    %c0_27 = arith.constant 0 : index
    %91 = vector.load %arg8[%90, %c0_26, %c0_27] : memref<8x8x128xf32, #tpu.memory_space<vmem>>, vector<1x8x128xf32>
    %92 = vector.shape_cast %91 : vector<1x8x128xf32> to vector<8x128xf32>
    %93 = vector.shape_cast %83 : vector<8x128xf32> to vector<1x8x128xf32>
    tpu.vector_store %arg8[%90, %c0_26, %c0_27], %93 {strides = array<i32>} : memref<8x8x128xf32, #tpu.memory_space<vmem>>, vector<1x8x128xf32>,
    %c2_i32 = arith.constant 2 : i32
    %cst_28 = arith.constant dense<0.000000e+00> : vector<8x512xf32>
    %94 = tpu.matmul %83, %0, %cst_28 {dimension_numbers = #tpu.dot_dimension_numbers<[1], [0], [0], [1], [0, 0, 1, 1], [], []>} : vector<8x128xf32>, vector<128x512xf32>, vector<8x512xf32> -> vector<8x512xf32>
    %95 = arith.index_cast %c2_i32 : i32 to index
    %c0_29 = arith.constant 0 : index
    %c0_30 = arith.constant 0 : index
    %96 = vector.load %arg0[%95, %c0_29, %c0_30] : memref<8x8x512xf32, #tpu.memory_space<vmem>>, vector<1x8x512xf32>
    %97 = vector.shape_cast %96 : vector<1x8x512xf32> to vector<8x512xf32>
    %98 = arith.addf %94, %97 : vector<8x512xf32>
    %99 = vector.extract_strided_slice %98 {offsets = [0, 0], sizes = [8, 128], strides = [1, 1]} : vector<8x512xf32> to vector<8x128xf32>
    %100 = arith.negf %99 : vector<8x128xf32>
    %101 = math.exp %100 : vector<8x128xf32>
    %cst_31 = arith.constant 1.000000e+00 : f32
    %102 = vector.broadcast %cst_31 : f32 to vector<8x128xf32>
    %103 = arith.addf %102, %101 : vector<8x128xf32>
    %104 = arith.divf %102, %103 : vector<8x128xf32>
    %105 = vector.extract_strided_slice %98 {offsets = [0, 128], sizes = [8, 128], strides = [1, 1]} : vector<8x512xf32> to vector<8x128xf32>
    %106 = arith.negf %105 : vector<8x128xf32>
    %107 = math.exp %106 : vector<8x128xf32>
    %cst_32 = arith.constant 1.000000e+00 : f32
    %108 = vector.broadcast %cst_32 : f32 to vector<8x128xf32>
    %109 = arith.addf %108, %107 : vector<8x128xf32>
    %110 = arith.divf %108, %109 : vector<8x128xf32>
    %111 = vector.extract_strided_slice %98 {offsets = [0, 256], sizes = [8, 128], strides = [1, 1]} : vector<8x512xf32> to vector<8x128xf32>
    %112 = math.tanh %111 : vector<8x128xf32>
    %113 = vector.extract_strided_slice %98 {offsets = [0, 384], sizes = [8, 128], strides = [1, 1]} : vector<8x512xf32> to vector<8x128xf32>
    %114 = arith.negf %113 : vector<8x128xf32>
    %115 = math.exp %114 : vector<8x128xf32>
    %cst_33 = arith.constant 1.000000e+00 : f32
    %116 = vector.broadcast %cst_33 : f32 to vector<8x128xf32>
    %117 = arith.addf %116, %115 : vector<8x128xf32>
    %118 = arith.divf %116, %117 : vector<8x128xf32>
    %119 = arith.mulf %110, %84 : vector<8x128xf32>
    %120 = arith.mulf %104, %112 : vector<8x128xf32>
    %121 = arith.addf %119, %120 : vector<8x128xf32>
    %122 = math.tanh %121 : vector<8x128xf32>
    %123 = arith.mulf %118, %122 : vector<8x128xf32>
    %124 = arith.index_cast %c2_i32 : i32 to index
    %c0_34 = arith.constant 0 : index
    %c0_35 = arith.constant 0 : index
    %125 = vector.load %arg1[%124, %c0_34, %c0_35] : memref<8x8x128xf32, #tpu.memory_space<vmem>>, vector<1x8x128xf32>
    %126 = vector.shape_cast %125 : vector<1x8x128xf32> to vector<8x128xf32>
    %cst_36 = arith.constant 0.000000e+00 : f32
    %127 = vector.broadcast %cst_36 : f32 to vector<8x128xf32>
    %128 = arith.cmpf ogt, %126, %127 : vector<8x128xf32>
    %129 = arith.select %128, %123, %83 : vector<8x128xi1>, vector<8x128xf32>
    %130 = arith.select %128, %121, %84 : vector<8x128xi1>, vector<8x128xf32>
    %131 = arith.index_cast %c2_i32 : i32 to index
    %c0_37 = arith.constant 0 : index
    %c0_38 = arith.constant 0 : index
    %132 = vector.load %arg7[%131, %c0_37, %c0_38] : memref<8x8x128xf32, #tpu.memory_space<vmem>>, vector<1x8x128xf32>
    %133 = vector.shape_cast %132 : vector<1x8x128xf32> to vector<8x128xf32>
    %134 = vector.shape_cast %129 : vector<8x128xf32> to vector<1x8x128xf32>
    tpu.vector_store %arg7[%131, %c0_37, %c0_38], %134 {strides = array<i32>} : memref<8x8x128xf32, #tpu.memory_space<vmem>>, vector<1x8x128xf32>,
    %c7_i32_39 = arith.constant 7 : i32
    %135 = arith.subi %c7_i32_39, %c2_i32 : i32
    %136 = arith.index_cast %135 : i32 to index
    %c0_40 = arith.constant 0 : index
    %c0_41 = arith.constant 0 : index
    %137 = vector.load %arg8[%136, %c0_40, %c0_41] : memref<8x8x128xf32, #tpu.memory_space<vmem>>, vector<1x8x128xf32>
    %138 = vector.shape_cast %137 : vector<1x8x128xf32> to vector<8x128xf32>
    %139 = vector.shape_cast %129 : vector<8x128xf32> to vector<1x8x128xf32>
    tpu.vector_store %arg8[%136, %c0_40, %c0_41], %139 {strides = array<i32>} : memref<8x8x128xf32, #tpu.memory_space<vmem>>, vector<1x8x128xf32>,
    %c3_i32 = arith.constant 3 : i32
    %cst_42 = arith.constant dense<0.000000e+00> : vector<8x512xf32>
    %140 = tpu.matmul %129, %0, %cst_42 {dimension_numbers = #tpu.dot_dimension_numbers<[1], [0], [0], [1], [0, 0, 1, 1], [], []>} : vector<8x128xf32>, vector<128x512xf32>, vector<8x512xf32> -> vector<8x512xf32>
    %141 = arith.index_cast %c3_i32 : i32 to index
    %c0_43 = arith.constant 0 : index
    %c0_44 = arith.constant 0 : index
    %142 = vector.load %arg0[%141, %c0_43, %c0_44] : memref<8x8x512xf32, #tpu.memory_space<vmem>>, vector<1x8x512xf32>
    %143 = vector.shape_cast %142 : vector<1x8x512xf32> to vector<8x512xf32>
    %144 = arith.addf %140, %143 : vector<8x512xf32>
    %145 = vector.extract_strided_slice %144 {offsets = [0, 0], sizes = [8, 128], strides = [1, 1]} : vector<8x512xf32> to vector<8x128xf32>
    %146 = arith.negf %145 : vector<8x128xf32>
    %147 = math.exp %146 : vector<8x128xf32>
    %cst_45 = arith.constant 1.000000e+00 : f32
    %148 = vector.broadcast %cst_45 : f32 to vector<8x128xf32>
    %149 = arith.addf %148, %147 : vector<8x128xf32>
    %150 = arith.divf %148, %149 : vector<8x128xf32>
    %151 = vector.extract_strided_slice %144 {offsets = [0, 128], sizes = [8, 128], strides = [1, 1]} : vector<8x512xf32> to vector<8x128xf32>
    %152 = arith.negf %151 : vector<8x128xf32>
    %153 = math.exp %152 : vector<8x128xf32>
    %cst_46 = arith.constant 1.000000e+00 : f32
    %154 = vector.broadcast %cst_46 : f32 to vector<8x128xf32>
    %155 = arith.addf %154, %153 : vector<8x128xf32>
    %156 = arith.divf %154, %155 : vector<8x128xf32>
    %157 = vector.extract_strided_slice %144 {offsets = [0, 256], sizes = [8, 128], strides = [1, 1]} : vector<8x512xf32> to vector<8x128xf32>
    %158 = math.tanh %157 : vector<8x128xf32>
    %159 = vector.extract_strided_slice %144 {offsets = [0, 384], sizes = [8, 128], strides = [1, 1]} : vector<8x512xf32> to vector<8x128xf32>
    %160 = arith.negf %159 : vector<8x128xf32>
    %161 = math.exp %160 : vector<8x128xf32>
    %cst_47 = arith.constant 1.000000e+00 : f32
    %162 = vector.broadcast %cst_47 : f32 to vector<8x128xf32>
    %163 = arith.addf %162, %161 : vector<8x128xf32>
    %164 = arith.divf %162, %163 : vector<8x128xf32>
    %165 = arith.mulf %156, %130 : vector<8x128xf32>
    %166 = arith.mulf %150, %158 : vector<8x128xf32>
    %167 = arith.addf %165, %166 : vector<8x128xf32>
    %168 = math.tanh %167 : vector<8x128xf32>
    %169 = arith.mulf %164, %168 : vector<8x128xf32>
    %170 = arith.index_cast %c3_i32 : i32 to index
    %c0_48 = arith.constant 0 : index
    %c0_49 = arith.constant 0 : index
    %171 = vector.load %arg1[%170, %c0_48, %c0_49] : memref<8x8x128xf32, #tpu.memory_space<vmem>>, vector<1x8x128xf32>
    %172 = vector.shape_cast %171 : vector<1x8x128xf32> to vector<8x128xf32>
    %cst_50 = arith.constant 0.000000e+00 : f32
    %173 = vector.broadcast %cst_50 : f32 to vector<8x128xf32>
    %174 = arith.cmpf ogt, %172, %173 : vector<8x128xf32>
    %175 = arith.select %174, %169, %129 : vector<8x128xi1>, vector<8x128xf32>
    %176 = arith.select %174, %167, %130 : vector<8x128xi1>, vector<8x128xf32>
    %177 = arith.index_cast %c3_i32 : i32 to index
    %c0_51 = arith.constant 0 : index
    %c0_52 = arith.constant 0 : index
    %178 = vector.load %arg7[%177, %c0_51, %c0_52] : memref<8x8x128xf32, #tpu.memory_space<vmem>>, vector<1x8x128xf32>
    %179 = vector.shape_cast %178 : vector<1x8x128xf32> to vector<8x128xf32>
    %180 = vector.shape_cast %175 : vector<8x128xf32> to vector<1x8x128xf32>
    tpu.vector_store %arg7[%177, %c0_51, %c0_52], %180 {strides = array<i32>} : memref<8x8x128xf32, #tpu.memory_space<vmem>>, vector<1x8x128xf32>,
    %c7_i32_53 = arith.constant 7 : i32
    %181 = arith.subi %c7_i32_53, %c3_i32 : i32
    %182 = arith.index_cast %181 : i32 to index
    %c0_54 = arith.constant 0 : index
    %c0_55 = arith.constant 0 : index
    %183 = vector.load %arg8[%182, %c0_54, %c0_55] : memref<8x8x128xf32, #tpu.memory_space<vmem>>, vector<1x8x128xf32>
    %184 = vector.shape_cast %183 : vector<1x8x128xf32> to vector<8x128xf32>
    %185 = vector.shape_cast %175 : vector<8x128xf32> to vector<1x8x128xf32>
    tpu.vector_store %arg8[%182, %c0_54, %c0_55], %185 {strides = array<i32>} : memref<8x8x128xf32, #tpu.memory_space<vmem>>, vector<1x8x128xf32>,
    %c4_i32 = arith.constant 4 : i32
    %cst_56 = arith.constant dense<0.000000e+00> : vector<8x512xf32>
    %186 = tpu.matmul %175, %0, %cst_56 {dimension_numbers = #tpu.dot_dimension_numbers<[1], [0], [0], [1], [0, 0, 1, 1], [], []>} : vector<8x128xf32>, vector<128x512xf32>, vector<8x512xf32> -> vector<8x512xf32>
    %187 = arith.index_cast %c4_i32 : i32 to index
    %c0_57 = arith.constant 0 : index
    %c0_58 = arith.constant 0 : index
    %188 = vector.load %arg0[%187, %c0_57, %c0_58] : memref<8x8x512xf32, #tpu.memory_space<vmem>>, vector<1x8x512xf32>
    %189 = vector.shape_cast %188 : vector<1x8x512xf32> to vector<8x512xf32>
    %190 = arith.addf %186, %189 : vector<8x512xf32>
    %191 = vector.extract_strided_slice %190 {offsets = [0, 0], sizes = [8, 128], strides = [1, 1]} : vector<8x512xf32> to vector<8x128xf32>
    %192 = arith.negf %191 : vector<8x128xf32>
    %193 = math.exp %192 : vector<8x128xf32>
    %cst_59 = arith.constant 1.000000e+00 : f32
    %194 = vector.broadcast %cst_59 : f32 to vector<8x128xf32>
    %195 = arith.addf %194, %193 : vector<8x128xf32>
    %196 = arith.divf %194, %195 : vector<8x128xf32>
    %197 = vector.extract_strided_slice %190 {offsets = [0, 128], sizes = [8, 128], strides = [1, 1]} : vector<8x512xf32> to vector<8x128xf32>
    %198 = arith.negf %197 : vector<8x128xf32>
    %199 = math.exp %198 : vector<8x128xf32>
    %cst_60 = arith.constant 1.000000e+00 : f32
    %200 = vector.broadcast %cst_60 : f32 to vector<8x128xf32>
    %201 = arith.addf %200, %199 : vector<8x128xf32>
    %202 = arith.divf %200, %201 : vector<8x128xf32>
    %203 = vector.extract_strided_slice %190 {offsets = [0, 256], sizes = [8, 128], strides = [1, 1]} : vector<8x512xf32> to vector<8x128xf32>
    %204 = math.tanh %203 : vector<8x128xf32>
    %205 = vector.extract_strided_slice %190 {offsets = [0, 384], sizes = [8, 128], strides = [1, 1]} : vector<8x512xf32> to vector<8x128xf32>
    %206 = arith.negf %205 : vector<8x128xf32>
    %207 = math.exp %206 : vector<8x128xf32>
    %cst_61 = arith.constant 1.000000e+00 : f32
    %208 = vector.broadcast %cst_61 : f32 to vector<8x128xf32>
    %209 = arith.addf %208, %207 : vector<8x128xf32>
    %210 = arith.divf %208, %209 : vector<8x128xf32>
    %211 = arith.mulf %202, %176 : vector<8x128xf32>
    %212 = arith.mulf %196, %204 : vector<8x128xf32>
    %213 = arith.addf %211, %212 : vector<8x128xf32>
    %214 = math.tanh %213 : vector<8x128xf32>
    %215 = arith.mulf %210, %214 : vector<8x128xf32>
    %216 = arith.index_cast %c4_i32 : i32 to index
    %c0_62 = arith.constant 0 : index
    %c0_63 = arith.constant 0 : index
    %217 = vector.load %arg1[%216, %c0_62, %c0_63] : memref<8x8x128xf32, #tpu.memory_space<vmem>>, vector<1x8x128xf32>
    %218 = vector.shape_cast %217 : vector<1x8x128xf32> to vector<8x128xf32>
    %cst_64 = arith.constant 0.000000e+00 : f32
    %219 = vector.broadcast %cst_64 : f32 to vector<8x128xf32>
    %220 = arith.cmpf ogt, %218, %219 : vector<8x128xf32>
    %221 = arith.select %220, %215, %175 : vector<8x128xi1>, vector<8x128xf32>
    %222 = arith.select %220, %213, %176 : vector<8x128xi1>, vector<8x128xf32>
    %223 = arith.index_cast %c4_i32 : i32 to index
    %c0_65 = arith.constant 0 : index
    %c0_66 = arith.constant 0 : index
    %224 = vector.load %arg7[%223, %c0_65, %c0_66] : memref<8x8x128xf32, #tpu.memory_space<vmem>>, vector<1x8x128xf32>
    %225 = vector.shape_cast %224 : vector<1x8x128xf32> to vector<8x128xf32>
    %226 = vector.shape_cast %221 : vector<8x128xf32> to vector<1x8x128xf32>
    tpu.vector_store %arg7[%223, %c0_65, %c0_66], %226 {strides = array<i32>} : memref<8x8x128xf32, #tpu.memory_space<vmem>>, vector<1x8x128xf32>,
    %c7_i32_67 = arith.constant 7 : i32
    %227 = arith.subi %c7_i32_67, %c4_i32 : i32
    %228 = arith.index_cast %227 : i32 to index
    %c0_68 = arith.constant 0 : index
    %c0_69 = arith.constant 0 : index
    %229 = vector.load %arg8[%228, %c0_68, %c0_69] : memref<8x8x128xf32, #tpu.memory_space<vmem>>, vector<1x8x128xf32>
    %230 = vector.shape_cast %229 : vector<1x8x128xf32> to vector<8x128xf32>
    %231 = vector.shape_cast %221 : vector<8x128xf32> to vector<1x8x128xf32>
    tpu.vector_store %arg8[%228, %c0_68, %c0_69], %231 {strides = array<i32>} : memref<8x8x128xf32, #tpu.memory_space<vmem>>, vector<1x8x128xf32>,
    %c5_i32 = arith.constant 5 : i32
    %cst_70 = arith.constant dense<0.000000e+00> : vector<8x512xf32>
    %232 = tpu.matmul %221, %0, %cst_70 {dimension_numbers = #tpu.dot_dimension_numbers<[1], [0], [0], [1], [0, 0, 1, 1], [], []>} : vector<8x128xf32>, vector<128x512xf32>, vector<8x512xf32> -> vector<8x512xf32>
    %233 = arith.index_cast %c5_i32 : i32 to index
    %c0_71 = arith.constant 0 : index
    %c0_72 = arith.constant 0 : index
    %234 = vector.load %arg0[%233, %c0_71, %c0_72] : memref<8x8x512xf32, #tpu.memory_space<vmem>>, vector<1x8x512xf32>
    %235 = vector.shape_cast %234 : vector<1x8x512xf32> to vector<8x512xf32>
    %236 = arith.addf %232, %235 : vector<8x512xf32>
    %237 = vector.extract_strided_slice %236 {offsets = [0, 0], sizes = [8, 128], strides = [1, 1]} : vector<8x512xf32> to vector<8x128xf32>
    %238 = arith.negf %237 : vector<8x128xf32>
    %239 = math.exp %238 : vector<8x128xf32>
    %cst_73 = arith.constant 1.000000e+00 : f32
    %240 = vector.broadcast %cst_73 : f32 to vector<8x128xf32>
    %241 = arith.addf %240, %239 : vector<8x128xf32>
    %242 = arith.divf %240, %241 : vector<8x128xf32>
    %243 = vector.extract_strided_slice %236 {offsets = [0, 128], sizes = [8, 128], strides = [1, 1]} : vector<8x512xf32> to vector<8x128xf32>
    %244 = arith.negf %243 : vector<8x128xf32>
    %245 = math.exp %244 : vector<8x128xf32>
    %cst_74 = arith.constant 1.000000e+00 : f32
    %246 = vector.broadcast %cst_74 : f32 to vector<8x128xf32>
    %247 = arith.addf %246, %245 : vector<8x128xf32>
    %248 = arith.divf %246, %247 : vector<8x128xf32>
    %249 = vector.extract_strided_slice %236 {offsets = [0, 256], sizes = [8, 128], strides = [1, 1]} : vector<8x512xf32> to vector<8x128xf32>
    %250 = math.tanh %249 : vector<8x128xf32>
    %251 = vector.extract_strided_slice %236 {offsets = [0, 384], sizes = [8, 128], strides = [1, 1]} : vector<8x512xf32> to vector<8x128xf32>
    %252 = arith.negf %251 : vector<8x128xf32>
    %253 = math.exp %252 : vector<8x128xf32>
    %cst_75 = arith.constant 1.000000e+00 : f32
    %254 = vector.broadcast %cst_75 : f32 to vector<8x128xf32>
    %255 = arith.addf %254, %253 : vector<8x128xf32>
    %256 = arith.divf %254, %255 : vector<8x128xf32>
    %257 = arith.mulf %248, %222 : vector<8x128xf32>
    %258 = arith.mulf %242, %250 : vector<8x128xf32>
    %259 = arith.addf %257, %258 : vector<8x128xf32>
    %260 = math.tanh %259 : vector<8x128xf32>
    %261 = arith.mulf %256, %260 : vector<8x128xf32>
    %262 = arith.index_cast %c5_i32 : i32 to index
    %c0_76 = arith.constant 0 : index
    %c0_77 = arith.constant 0 : index
    %263 = vector.load %arg1[%262, %c0_76, %c0_77] : memref<8x8x128xf32, #tpu.memory_space<vmem>>, vector<1x8x128xf32>
    %264 = vector.shape_cast %263 : vector<1x8x128xf32> to vector<8x128xf32>
    %cst_78 = arith.constant 0.000000e+00 : f32
    %265 = vector.broadcast %cst_78 : f32 to vector<8x128xf32>
    %266 = arith.cmpf ogt, %264, %265 : vector<8x128xf32>
    %267 = arith.select %266, %261, %221 : vector<8x128xi1>, vector<8x128xf32>
    %268 = arith.select %266, %259, %222 : vector<8x128xi1>, vector<8x128xf32>
    %269 = arith.index_cast %c5_i32 : i32 to index
    %c0_79 = arith.constant 0 : index
    %c0_80 = arith.constant 0 : index
    %270 = vector.load %arg7[%269, %c0_79, %c0_80] : memref<8x8x128xf32, #tpu.memory_space<vmem>>, vector<1x8x128xf32>
    %271 = vector.shape_cast %270 : vector<1x8x128xf32> to vector<8x128xf32>
    %272 = vector.shape_cast %267 : vector<8x128xf32> to vector<1x8x128xf32>
    tpu.vector_store %arg7[%269, %c0_79, %c0_80], %272 {strides = array<i32>} : memref<8x8x128xf32, #tpu.memory_space<vmem>>, vector<1x8x128xf32>,
    %c7_i32_81 = arith.constant 7 : i32
    %273 = arith.subi %c7_i32_81, %c5_i32 : i32
    %274 = arith.index_cast %273 : i32 to index
    %c0_82 = arith.constant 0 : index
    %c0_83 = arith.constant 0 : index
    %275 = vector.load %arg8[%274, %c0_82, %c0_83] : memref<8x8x128xf32, #tpu.memory_space<vmem>>, vector<1x8x128xf32>
    %276 = vector.shape_cast %275 : vector<1x8x128xf32> to vector<8x128xf32>
    %277 = vector.shape_cast %267 : vector<8x128xf32> to vector<1x8x128xf32>
    tpu.vector_store %arg8[%274, %c0_82, %c0_83], %277 {strides = array<i32>} : memref<8x8x128xf32, #tpu.memory_space<vmem>>, vector<1x8x128xf32>,
    %c6_i32 = arith.constant 6 : i32
    %cst_84 = arith.constant dense<0.000000e+00> : vector<8x512xf32>
    %278 = tpu.matmul %267, %0, %cst_84 {dimension_numbers = #tpu.dot_dimension_numbers<[1], [0], [0], [1], [0, 0, 1, 1], [], []>} : vector<8x128xf32>, vector<128x512xf32>, vector<8x512xf32> -> vector<8x512xf32>
    %279 = arith.index_cast %c6_i32 : i32 to index
    %c0_85 = arith.constant 0 : index
    %c0_86 = arith.constant 0 : index
    %280 = vector.load %arg0[%279, %c0_85, %c0_86] : memref<8x8x512xf32, #tpu.memory_space<vmem>>, vector<1x8x512xf32>
    %281 = vector.shape_cast %280 : vector<1x8x512xf32> to vector<8x512xf32>
    %282 = arith.addf %278, %281 : vector<8x512xf32>
    %283 = vector.extract_strided_slice %282 {offsets = [0, 0], sizes = [8, 128], strides = [1, 1]} : vector<8x512xf32> to vector<8x128xf32>
    %284 = arith.negf %283 : vector<8x128xf32>
    %285 = math.exp %284 : vector<8x128xf32>
    %cst_87 = arith.constant 1.000000e+00 : f32
    %286 = vector.broadcast %cst_87 : f32 to vector<8x128xf32>
    %287 = arith.addf %286, %285 : vector<8x128xf32>
    %288 = arith.divf %286, %287 : vector<8x128xf32>
    %289 = vector.extract_strided_slice %282 {offsets = [0, 128], sizes = [8, 128], strides = [1, 1]} : vector<8x512xf32> to vector<8x128xf32>
    %290 = arith.negf %289 : vector<8x128xf32>
    %291 = math.exp %290 : vector<8x128xf32>
    %cst_88 = arith.constant 1.000000e+00 : f32
    %292 = vector.broadcast %cst_88 : f32 to vector<8x128xf32>
    %293 = arith.addf %292, %291 : vector<8x128xf32>
    %294 = arith.divf %292, %293 : vector<8x128xf32>
    %295 = vector.extract_strided_slice %282 {offsets = [0, 256], sizes = [8, 128], strides = [1, 1]} : vector<8x512xf32> to vector<8x128xf32>
    %296 = math.tanh %295 : vector<8x128xf32>
    %297 = vector.extract_strided_slice %282 {offsets = [0, 384], sizes = [8, 128], strides = [1, 1]} : vector<8x512xf32> to vector<8x128xf32>
    %298 = arith.negf %297 : vector<8x128xf32>
    %299 = math.exp %298 : vector<8x128xf32>
    %cst_89 = arith.constant 1.000000e+00 : f32
    %300 = vector.broadcast %cst_89 : f32 to vector<8x128xf32>
    %301 = arith.addf %300, %299 : vector<8x128xf32>
    %302 = arith.divf %300, %301 : vector<8x128xf32>
    %303 = arith.mulf %294, %268 : vector<8x128xf32>
    %304 = arith.mulf %288, %296 : vector<8x128xf32>
    %305 = arith.addf %303, %304 : vector<8x128xf32>
    %306 = math.tanh %305 : vector<8x128xf32>
    %307 = arith.mulf %302, %306 : vector<8x128xf32>
    %308 = arith.index_cast %c6_i32 : i32 to index
    %c0_90 = arith.constant 0 : index
    %c0_91 = arith.constant 0 : index
    %309 = vector.load %arg1[%308, %c0_90, %c0_91] : memref<8x8x128xf32, #tpu.memory_space<vmem>>, vector<1x8x128xf32>
    %310 = vector.shape_cast %309 : vector<1x8x128xf32> to vector<8x128xf32>
    %cst_92 = arith.constant 0.000000e+00 : f32
    %311 = vector.broadcast %cst_92 : f32 to vector<8x128xf32>
    %312 = arith.cmpf ogt, %310, %311 : vector<8x128xf32>
    %313 = arith.select %312, %307, %267 : vector<8x128xi1>, vector<8x128xf32>
    %314 = arith.select %312, %305, %268 : vector<8x128xi1>, vector<8x128xf32>
    %315 = arith.index_cast %c6_i32 : i32 to index
    %c0_93 = arith.constant 0 : index
    %c0_94 = arith.constant 0 : index
    %316 = vector.load %arg7[%315, %c0_93, %c0_94] : memref<8x8x128xf32, #tpu.memory_space<vmem>>, vector<1x8x128xf32>
    %317 = vector.shape_cast %316 : vector<1x8x128xf32> to vector<8x128xf32>
    %318 = vector.shape_cast %313 : vector<8x128xf32> to vector<1x8x128xf32>
    tpu.vector_store %arg7[%315, %c0_93, %c0_94], %318 {strides = array<i32>} : memref<8x8x128xf32, #tpu.memory_space<vmem>>, vector<1x8x128xf32>,
    %c7_i32_95 = arith.constant 7 : i32
    %319 = arith.subi %c7_i32_95, %c6_i32 : i32
    %320 = arith.index_cast %319 : i32 to index
    %c0_96 = arith.constant 0 : index
    %c0_97 = arith.constant 0 : index
    %321 = vector.load %arg8[%320, %c0_96, %c0_97] : memref<8x8x128xf32, #tpu.memory_space<vmem>>, vector<1x8x128xf32>
    %322 = vector.shape_cast %321 : vector<1x8x128xf32> to vector<8x128xf32>
    %323 = vector.shape_cast %313 : vector<8x128xf32> to vector<1x8x128xf32>
    tpu.vector_store %arg8[%320, %c0_96, %c0_97], %323 {strides = array<i32>} : memref<8x8x128xf32, #tpu.memory_space<vmem>>, vector<1x8x128xf32>,
    %c7_i32_98 = arith.constant 7 : i32
    %cst_99 = arith.constant dense<0.000000e+00> : vector<8x512xf32>
    %324 = tpu.matmul %313, %0, %cst_99 {dimension_numbers = #tpu.dot_dimension_numbers<[1], [0], [0], [1], [0, 0, 1, 1], [], []>} : vector<8x128xf32>, vector<128x512xf32>, vector<8x512xf32> -> vector<8x512xf32>
    %325 = arith.index_cast %c7_i32_98 : i32 to index
    %c0_100 = arith.constant 0 : index
    %c0_101 = arith.constant 0 : index
    %326 = vector.load %arg0[%325, %c0_100, %c0_101] : memref<8x8x512xf32, #tpu.memory_space<vmem>>, vector<1x8x512xf32>
    %327 = vector.shape_cast %326 : vector<1x8x512xf32> to vector<8x512xf32>
    %328 = arith.addf %324, %327 : vector<8x512xf32>
    %329 = vector.extract_strided_slice %328 {offsets = [0, 0], sizes = [8, 128], strides = [1, 1]} : vector<8x512xf32> to vector<8x128xf32>
    %330 = arith.negf %329 : vector<8x128xf32>
    %331 = math.exp %330 : vector<8x128xf32>
    %cst_102 = arith.constant 1.000000e+00 : f32
    %332 = vector.broadcast %cst_102 : f32 to vector<8x128xf32>
    %333 = arith.addf %332, %331 : vector<8x128xf32>
    %334 = arith.divf %332, %333 : vector<8x128xf32>
    %335 = vector.extract_strided_slice %328 {offsets = [0, 128], sizes = [8, 128], strides = [1, 1]} : vector<8x512xf32> to vector<8x128xf32>
    %336 = arith.negf %335 : vector<8x128xf32>
    %337 = math.exp %336 : vector<8x128xf32>
    %cst_103 = arith.constant 1.000000e+00 : f32
    %338 = vector.broadcast %cst_103 : f32 to vector<8x128xf32>
    %339 = arith.addf %338, %337 : vector<8x128xf32>
    %340 = arith.divf %338, %339 : vector<8x128xf32>
    %341 = vector.extract_strided_slice %328 {offsets = [0, 256], sizes = [8, 128], strides = [1, 1]} : vector<8x512xf32> to vector<8x128xf32>
    %342 = math.tanh %341 : vector<8x128xf32>
    %343 = vector.extract_strided_slice %328 {offsets = [0, 384], sizes = [8, 128], strides = [1, 1]} : vector<8x512xf32> to vector<8x128xf32>
    %344 = arith.negf %343 : vector<8x128xf32>
    %345 = math.exp %344 : vector<8x128xf32>
    %cst_104 = arith.constant 1.000000e+00 : f32
    %346 = vector.broadcast %cst_104 : f32 to vector<8x128xf32>
    %347 = arith.addf %346, %345 : vector<8x128xf32>
    %348 = arith.divf %346, %347 : vector<8x128xf32>
    %349 = arith.mulf %340, %314 : vector<8x128xf32>
    %350 = arith.mulf %334, %342 : vector<8x128xf32>
    %351 = arith.addf %349, %350 : vector<8x128xf32>
    %352 = math.tanh %351 : vector<8x128xf32>
    %353 = arith.mulf %348, %352 : vector<8x128xf32>
    %354 = arith.index_cast %c7_i32_98 : i32 to index
    %c0_105 = arith.constant 0 : index
    %c0_106 = arith.constant 0 : index
    %355 = vector.load %arg1[%354, %c0_105, %c0_106] : memref<8x8x128xf32, #tpu.memory_space<vmem>>, vector<1x8x128xf32>
    %356 = vector.shape_cast %355 : vector<1x8x128xf32> to vector<8x128xf32>
    %cst_107 = arith.constant 0.000000e+00 : f32
    %357 = vector.broadcast %cst_107 : f32 to vector<8x128xf32>
    %358 = arith.cmpf ogt, %356, %357 : vector<8x128xf32>
    %359 = arith.select %358, %353, %313 : vector<8x128xi1>, vector<8x128xf32>
    %360 = arith.select %358, %351, %314 : vector<8x128xi1>, vector<8x128xf32>
    %361 = arith.index_cast %c7_i32_98 : i32 to index
    %c0_108 = arith.constant 0 : index
    %c0_109 = arith.constant 0 : index
    %362 = vector.load %arg7[%361, %c0_108, %c0_109] : memref<8x8x128xf32, #tpu.memory_space<vmem>>, vector<1x8x128xf32>
    %363 = vector.shape_cast %362 : vector<1x8x128xf32> to vector<8x128xf32>
    %364 = vector.shape_cast %359 : vector<8x128xf32> to vector<1x8x128xf32>
    tpu.vector_store %arg7[%361, %c0_108, %c0_109], %364 {strides = array<i32>} : memref<8x8x128xf32, #tpu.memory_space<vmem>>, vector<1x8x128xf32>,
    %c7_i32_110 = arith.constant 7 : i32
    %365 = arith.subi %c7_i32_110, %c7_i32_98 : i32
    %366 = arith.index_cast %365 : i32 to index
    %c0_111 = arith.constant 0 : index
    %c0_112 = arith.constant 0 : index
    %367 = vector.load %arg8[%366, %c0_111, %c0_112] : memref<8x8x128xf32, #tpu.memory_space<vmem>>, vector<1x8x128xf32>
    %368 = vector.shape_cast %367 : vector<1x8x128xf32> to vector<8x128xf32>
    %369 = vector.shape_cast %359 : vector<8x128xf32> to vector<1x8x128xf32>
    tpu.vector_store %arg8[%366, %c0_111, %c0_112], %369 {strides = array<i32>} : memref<8x8x128xf32, #tpu.memory_space<vmem>>, vector<1x8x128xf32>,
    %c8_i32 = arith.constant 8 : i32
    %c0_113 = arith.constant 0 : index
    %c0_114 = arith.constant 0 : index
    %c0_115 = arith.constant 0 : index
    %370 = vector.load %arg7[%c0_113, %c0_114, %c0_115] : memref<8x8x128xf32, #tpu.memory_space<vmem>>, vector<8x8x128xf32>
    %371 = vector.extract_strided_slice %370 {offsets = [0, 0, 0], sizes = [8, 8, 32], strides = [1, 1, 1]} : vector<8x8x128xf32> to vector<8x8x32xf32>
    %c0_116 = arith.constant 0 : index
    %c0_117 = arith.constant 0 : index
    %c0_118 = arith.constant 0 : index
    %372 = vector.load %arg8[%c0_116, %c0_117, %c0_118] : memref<8x8x128xf32, #tpu.memory_space<vmem>>, vector<8x8x128xf32>
    %373 = vector.extract_strided_slice %372 {offsets = [0, 0, 32], sizes = [8, 8, 32], strides = [1, 1, 1]} : vector<8x8x128xf32> to vector<8x8x32xf32>
    %374 = arith.addf %371, %373 : vector<8x8x32xf32>
    %c0_119 = arith.constant 0 : index
    %c0_120 = arith.constant 0 : index
    %c0_121 = arith.constant 0 : index
    %375 = vector.load %arg2[%c0_119, %c0_120, %c0_121] : memref<8x8x1xf32, #tpu.memory_space<vmem>>, vector<8x8x1xf32>
    %376 = vector.broadcast %375 : vector<8x8x1xf32> to vector<8x8x32xf32>
    %377 = arith.mulf %374, %376 : vector<8x8x32xf32>
    %378 = vector.shape_cast %377 : vector<8x8x32xf32> to vector<64x32xf32>
    %c0_122 = arith.constant 0 : index
    %c0_123 = arith.constant 0 : index
    %379 = vector.load %arg4[%c0_122, %c0_123] : memref<32x128xf32, #tpu.memory_space<vmem>>, vector<32x128xf32>
    %cst_124 = arith.constant dense<0.000000e+00> : vector<64x128xf32>
    %380 = tpu.matmul %378, %379, %cst_124 {dimension_numbers = #tpu.dot_dimension_numbers<[1], [0], [0], [1], [0, 0, 1, 1], [], []>} : vector<64x32xf32>, vector<32x128xf32>, vector<64x128xf32> -> vector<64x128xf32>
    %c0_125 = arith.constant 0 : index
    %c0_126 = arith.constant 0 : index
    %381 = vector.load %arg5[%c0_125, %c0_126] : memref<1x128xf32, #tpu.memory_space<vmem>>, vector<1x128xf32>
    %382 = vector.broadcast %381 : vector<1x128xf32> to vector<64x128xf32>
    %383 = arith.addf %380, %382 : vector<64x128xf32>
    %384 = vector.shape_cast %383 : vector<64x128xf32> to vector<8x8x128xf32>
    %c0_127 = arith.constant 0 : index
    %c0_128 = arith.constant 0 : index
    %c0_129 = arith.constant 0 : index
    %385 = vector.load %arg6[%c0_127, %c0_128, %c0_129] : memref<8x8x128xf32, #tpu.memory_space<vmem>>, vector<8x8x128xf32>
    tpu.vector_store %arg6[%c0_127, %c0_128, %c0_129], %384 {strides = array<i32>} : memref<8x8x128xf32, #tpu.memory_space<vmem>>, vector<8x8x128xf32>,
    return
  }
}

</mosaic_0001>

<bundles_post_ra>
// kernel: tpu_custom_call.1
= control target key start
LH: loop header
LB: loop body
LE: loop exit
PB: predicated region body
PF: predicated region fallthrough
CT: control target
= control target key end

     0   :  { %11 = vsyncpa [#allocation5], 0  ;;  %s3232_s0 = inlined_call_operand.hbm [shape: f32[8,8,512], index: 0, kind: input, shape index: {}]   ;;  %s3233_s1 = inlined_call_operand.vmem [shape: f32[8,8,128], index: 1, kind: input, shape index: {}]   ;;  %s3234_s2 = inlined_call_operand.vmem [shape: f32[8,8,1], index: 2, kind: input, shape index: {}]   ;;  %s3235_s3 = inlined_call_operand.hbm [shape: f32[128,512], index: 3, kind: input, shape index: {}]   ;;  %s3236_s4 = inlined_call_operand.hbm [shape: f32[32,128], index: 4, kind: input, shape index: {}]   ;;  %s3237_s5 = inlined_call_operand.vmem [shape: f32[1,128], index: 5, kind: input, shape index: {}]   ;;  %s3238_s6 = inlined_call_operand.hbm [shape: f32[8,8,128], index: 6, kind: output, shape index: {}]  }
   0x1   :  { %12 = vsyncpa [#allocation8], 0 }
   0x2   :  { %13 = vsyncpa [#allocation6], 0  ;;  %s2216_s21 = smov [#allocation7]   ;;  %s2217_s23 = smov [#allocation4]  }
   0x3   :  { %s35_s22 = sshll.u32 %s2216_s21, 4  ;;  %s19_s24 = sshll.u32 %s2217_s23, 4  ;;  %s36_s22 = int_to_ptr.vmem [resolvable:$true] %s35_s22  ;;  %s20_s24 = int_to_ptr.vmem [resolvable:$true] %s19_s24 }
   0x4   :  { %s2138_s25 = scalar_lea.vmem %s36_s22, 8192  ;;  %p2143_p1 = scmp.lt.s32.totalorder %s36_s22, %s36_s22 }
   0x5   :  { %p2139_p0 = scmp.ne.s32.totalorder %s36_s22, %s2138_s25  ;;  %p2144_p2 = scmp.lt.s32.totalorder %s2138_s25, %s2138_s25 }
   0x7   :  { %p2145_p3 = por %p2144_p2, %p2143_p1 }
   0x9   :  { %p2146_p4 = pnand %p2145_p3, %p2139_p0 }
   0xb   :  { %2149 = shalt.err (!%p2146_p4)
}
   0xc   :  { %s2218_s26 = smov 512   ;;  %s2219_s27 = smov 32  }
   0xd   :  { %41 = dma.hbm_to_vmem [thread:$0]  %s3235_s3, 8192, %s36_s22, [#allocation8], %s2218_s26, %s2218_s26, %s2219_s27  }
   0xe   :  { %s2158_s30 = scalar_lea.vmem %s20_s24, 4096  ;;  %p2163_p6 = scmp.lt.s32.totalorder %s20_s24, %s20_s24 }
   0xf   :  { %p2159_p5 = scmp.ne.s32.totalorder %s20_s24, %s2158_s30  ;;  %p2164_p7 = scmp.lt.s32.totalorder %s2158_s30, %s2158_s30 }
  0x11   :  { %p2165_p8 = por %p2164_p7, %p2163_p6 }
  0x13   :  { %p2166_p9 = pnand %p2165_p8, %p2159_p5 }
  0x15   :  { %2169 = shalt.err (!%p2166_p9)
}
  0x16   :  { %25 = dma.hbm_to_vmem [thread:$0]  %s3232_s0, 4096, %s20_s24, [#allocation5], %s2218_s26, %s2218_s26, %s2219_s27  }
  0x17   :  { %s2220_s9 = smov [#allocation9]  }
  0x18   :  { %s47_s10 = sshll.u32 %s2220_s9, 4  ;;  %s48_s10 = int_to_ptr.vmem [resolvable:$true] %s47_s10 }
  0x19   :  { %s2178_s11 = scalar_lea.vmem %s48_s10, 512  ;;  %p2183_p11 = scmp.lt.s32.totalorder %s48_s10, %s48_s10 }
  0x1a   :  { %p2179_p10 = scmp.ne.s32.totalorder %s48_s10, %s2178_s11  ;;  %p2184_p12 = scmp.lt.s32.totalorder %s2178_s11, %s2178_s11 }
  0x1c   :  { %p2185_p13 = por %p2184_p12, %p2183_p11 }
  0x1e   :  { %p2186_p0 = pnand %p2185_p13, %p2179_p10 }
  0x20   :  { %2189 = shalt.err (!%p2186_p0)
}
  0x21   :  { %s2221_s3 = smov 128   ;;  %s2222_s12 = smov 8  }
  0x22   :  { %53 = dma.hbm_to_vmem [thread:$0]  %s3236_s4, 512, %s48_s10, [#allocation8], %s2221_s3, %s2221_s3, %s2222_s12  }
  0x23   :  { %2210 = dma.done.wait [#allocation5], 4096  }
  0x24   :  { %2211 = vsyncadd [#allocation5], 4294963200 }
  0x25   :  { %2212 = dma.done.wait [#allocation8], 8704  }
  0x26   :  { %2213 = vsyncadd [#allocation8], 4294958592  ;;  %v3241_v0 = vmov 0.0   ;;  %v2276_v1 = vld [vmem:[#allocation7 + $0x1e8] sm:$0xff]  ;;  %v2278_v2 = vld [vmem:[#allocation7 + $0x1e0] sm:$0xff]  ;;  %s2225_s27 = smov 96  }
  0x27   :  { %197 = vmatprep.mubr.f32.mxu0 %v3241_v0  ;;  %268 = vmatprep.mubr.f32.mxu1 %v3241_v0  ;;  %3334 = vst [vmem:[#allocation14_spill] sm:$0xff] %v2276_v1  ;;  %v2280_v3 = vld [vmem:[#allocation7 + $0x1c8] sm:$0xff]  ;;  %v2283_v4 = vld [vmem:[#allocation7 + $0x1c0] sm:$0xff]  ;;  %v2297_v9 = vld [vmem:[#allocation7 + $0x1f8] sm:$0xff]  ;;  %vm1687_vm7 = vcmask 261120  }
  0x28   :  { %133 = vmatprep.subr.mxu0 %v2276_v1  ;;  %v2286_v5 = vld [vmem:[#allocation7 + $0x1a8] sm:$0xff]  ;;  %v2289_v6 = vld [vmem:[#allocation7 + $0x1a0] sm:$0xff]  ;;  %3335 = vst [vmem:[#allocation15_spill] sm:$0xff] %v2297_v9  ;;  %204 = vmatprep.subr.mxu1 %v2297_v9  ;;  %v2303_v11 = vld [vmem:[#allocation7 + $0x1f0] sm:$0xff] }
  0x29   :  { %134 = vmatpush1.msra.mxu0 %v2278_v2  ;;  %v2292_v7 = vld [vmem:[#allocation7 + $0x188] sm:$0xff]  ;;  %v2295_v8 = vld [vmem:[#allocation7 + $0x180] sm:$0xff]  ;;  %205 = vmatpush1.msra.mxu1 %v2303_v11  ;;  %v2309_v13 = vld [vmem:[#allocation7 + $0x1d8] sm:$0xff] }
  0x2a   :  { %135 = vmatprep.subr.mxu0 %v2280_v3  ;;  %v2300_v10 = vld [vmem:[#allocation7 + $0x168] sm:$0xff]  ;;  %v2306_v12 = vld [vmem:[#allocation7 + $0x160] sm:$0xff]  ;;  %v2311_v14 = vld [vmem:[#allocation7 + $0x1d0] sm:$0xff]  ;;  %206 = vmatprep.subr.mxu1 %v2309_v13 }
  0x2b   :  { %136 = vmatpush1.msra.mxu0 %v2283_v4  ;;  %v2314_v15 = vld [vmem:[#allocation7 + $0x148] sm:$0xff]  ;;  %v2317_v16 = vld [vmem:[#allocation7 + $0x1b8] sm:$0xff]  ;;  %v2320_v17 = vld [vmem:[#allocation7 + $0x140] sm:$0xff]  ;;  %207 = vmatpush1.msra.mxu1 %v2311_v14 }
  0x2c   :  { %137 = vmatprep.subr.mxu0 %v2286_v5  ;;  %v2323_v18 = vld [vmem:[#allocation7 + $0x1b0] sm:$0xff]  ;;  %v2325_v19 = vld [vmem:[#allocation7 + $0x198] sm:$0xff]  ;;  %v2328_v20 = vld [vmem:[#allocation7 + $0x128] sm:$0xff]  ;;  %208 = vmatprep.subr.mxu1 %v2317_v16 }
  0x2d   :  { %138 = vmatpush1.msra.mxu0 %v2289_v6  ;;  %v2331_v21 = vld [vmem:[#allocation7 + $0x190] sm:$0xff]  ;;  %v2334_v22 = vld [vmem:[#allocation7 + $0x120] sm:$0xff]  ;;  %209 = vmatpush1.msra.mxu1 %v2323_v18  ;;  %v2337_v23 = vld [vmem:[#allocation7 + $0x178] sm:$0xff] }
  0x2e   :  { %139 = vmatprep.subr.mxu0 %v2292_v7  ;;  %v2340_v24 = vld [vmem:[#allocation7 + $0x108] sm:$0xff]  ;;  %210 = vmatprep.subr.mxu1 %v2325_v19  ;;  %v2343_v25 = vld [vmem:[#allocation7 + $0x170] sm:$0xff]  ;;  %v2346_v26 = vld [vmem:[#allocation7 + $0x100] sm:$0xff] }
  0x2f   :  { %140 = vmatpush1.msra.mxu0 %v2295_v8  ;;  %211 = vmatpush1.msra.mxu1 %v2331_v21  ;;  %v2349_v27 = vld [vmem:[#allocation7 + $0x158] sm:$0xff]  ;;  %v2352_v28 = vld [vmem:[#allocation7 + $0xe8] sm:$0xff]  ;;  %v2355_v29 = vld [vmem:[#allocation7 + $0x150] sm:$0xff] }
  0x30   :  { %141 = vmatprep.subr.mxu0 %v2300_v10  ;;  %212 = vmatprep.subr.mxu1 %v2337_v23  ;;  %v2358_v30 = vld [vmem:[#allocation7 + $0xe0] sm:$0xff]  ;;  %v2361_v31 = vld [vmem:[#allocation7 + $0x138] sm:$0xff]  ;;  %v2364_v32 = vld [vmem:[#allocation7 + $0xc8] sm:$0xff] }
  0x31   :  { %142 = vmatpush1.msra.mxu0 %v2306_v12  ;;  %213 = vmatpush1.msra.mxu1 %v2343_v25  ;;  %v2367_v33 = vld [vmem:[#allocation7 + $0x130] sm:$0xff]  ;;  %v2370_v34 = vld [vmem:[#allocation7 + $0xc0] sm:$0xff]  ;;  %v2373_v35 = vld [vmem:[#allocation7 + $0x118] sm:$0xff] }
  0x32   :  { %143 = vmatprep.subr.mxu0 %v2314_v15  ;;  %214 = vmatprep.subr.mxu1 %v2349_v27  ;;  %v2376_v36 = vld [vmem:[#allocation7 + $0xa8] sm:$0xff]  ;;  %v2379_v37 = vld [vmem:[#allocation7 + $0x110] sm:$0xff]  ;;  %v2382_v38 = vld [vmem:[#allocation7 + $0xa0] sm:$0xff] }
  0x33   :  { %144 = vmatpush1.msra.mxu0 %v2320_v17  ;;  %215 = vmatpush1.msra.mxu1 %v2355_v29  ;;  %v2385_v39 = vld [vmem:[#allocation7 + $0xf8] sm:$0xff]  ;;  %v2388_v40 = vld [vmem:[#allocation7 + $0x88] sm:$0xff]  ;;  %v2391_v41 = vld [vmem:[#allocation7 + $0xf0] sm:$0xff] }
  0x34   :  { %145 = vmatprep.subr.mxu0 %v2328_v20  ;;  %216 = vmatprep.subr.mxu1 %v2361_v31  ;;  %v2394_v42 = vld [vmem:[#allocation7 + $0x80] sm:$0xff]  ;;  %v2397_v43 = vld [vmem:[#allocation7 + $0xd8] sm:$0xff]  ;;  %v2400_v44 = vld [vmem:[#allocation7 + $0x68] sm:$0xff] }
  0x35   :  { %146 = vmatpush1.msra.mxu0 %v2334_v22  ;;  %217 = vmatpush1.msra.mxu1 %v2367_v33  ;;  %3336 = vst [vmem:[#allocation16_spill] sm:$0xff] %v2394_v42  ;;  %3337 = vst [vmem:[#allocation17_spill] sm:$0xff] %v2400_v44  ;;  %v2403_v45 = vld [vmem:[#allocation7 + $0xd0] sm:$0xff]  ;;  %v2406_v46 = vld [vmem:[#allocation7 + $0x60] sm:$0xff] }
  0x36   :  { %147 = vmatprep.subr.mxu0 %v2340_v24  ;;  %218 = vmatprep.subr.mxu1 %v2373_v35  ;;  %3338 = vst [vmem:[#allocation18_spill] sm:$0xff] %v2406_v46  ;;  %v2409_v47 = vld [vmem:[#allocation7 + $0xb8] sm:$0xff]  ;;  %v2412_v48 = vld [vmem:[#allocation7 + $0x48] sm:$0xff]  ;;  %v2415_v49 = vld [vmem:[#allocation7 + $0xb0] sm:$0xff] }
  0x37   :  { %148 = vmatpush1.msra.mxu0 %v2346_v26  ;;  %219 = vmatpush1.msra.mxu1 %v2379_v37  ;;  %3339 = vst [vmem:[#allocation19_spill] sm:$0xff] %v2412_v48  ;;  %v2418_v50 = vld [vmem:[#allocation7 + $0x40] sm:$0xff]  ;;  %v2421_v51 = vld [vmem:[#allocation7 + $0x98] sm:$0xff]  ;;  %v2424_v52 = vld [vmem:[#allocation7 + $0x28] sm:$0xff] }
  0x38   :  { %149 = vmatprep.subr.mxu0 %v2352_v28  ;;  %220 = vmatprep.subr.mxu1 %v2385_v39  ;;  %3340 = vst [vmem:[#allocation20_spill] sm:$0xff] %v2418_v50  ;;  %3341 = vst [vmem:[#allocation21_spill] sm:$0xff] %v2421_v51  ;;  %v2427_v53 = vld [vmem:[#allocation7 + $0x90] sm:$0xff]  ;;  %v2430_v54 = vld [vmem:[#allocation7 + $0x20] sm:$0xff] }
  0x39   :  { %150 = vmatpush1.msra.mxu0 %v2358_v30  ;;  %221 = vmatpush1.msra.mxu1 %v2391_v41  ;;  %3342 = vst [vmem:[#allocation22_spill] sm:$0xff] %v2424_v52  ;;  %3343 = vst [vmem:[#allocation23_spill] sm:$0xff] %v2427_v53  ;;  %v2433_v55 = vld [vmem:[#allocation7 + $0x78] sm:$0xff]  ;;  %v2436_v56 = vld [vmem:[#allocation7 + $0x8] sm:$0xff] }
  0x3a   :  { %151 = vmatprep.subr.mxu0 %v2364_v32  ;;  %222 = vmatprep.subr.mxu1 %v2397_v43  ;;  %3344 = vst [vmem:[#allocation24_spill] sm:$0xff] %v2430_v54  ;;  %3345 = vst [vmem:[#allocation25_spill] sm:$0xff] %v2433_v55  ;;  %v2439_v57 = vld [vmem:[#allocation7 + $0x70] sm:$0xff]  ;;  %v2442_v58 = vld [vmem:[#allocation7] sm:$0xff] }
  0x3b   :  { %152 = vmatpush1.msra.mxu0 %v2370_v34  ;;  %223 = vmatpush1.msra.mxu1 %v2403_v45  ;;  %3346 = vst [vmem:[#allocation26_spill] sm:$0xff] %v2436_v56  ;;  %3347 = vst [vmem:[#allocation27_spill] sm:$0xff] %v2439_v57  ;;  %v2445_v59 = vld [vmem:[#allocation7 + $0x58] sm:$0xff]  ;;  %v2449_v60 = vld [vmem:[#allocation7 + $0x50] sm:$0xff] }
  0x3c   :  { %153 = vmatprep.subr.mxu0 %v2376_v36  ;;  %224 = vmatprep.subr.mxu1 %v2409_v47  ;;  %3348 = vst [vmem:[#allocation28_spill] sm:$0xff] %v2442_v58  ;;  %3349 = vst [vmem:[#allocation29_spill] sm:$0xff] %v2445_v59  ;;  %v2453_v61 = vld [vmem:[#allocation7 + $0x38] sm:$0xff]  ;;  %v2457_v62 = vld [vmem:[#allocation7 + $0x30] sm:$0xff] }
  0x3d   :  { %154 = vmatpush1.msra.mxu0 %v2382_v38  ;;  %225 = vmatpush1.msra.mxu1 %v2415_v49  ;;  %3350 = vst [vmem:[#allocation30_spill] sm:$0xff] %v2449_v60  ;;  %3351 = vst [vmem:[#allocation31_spill] sm:$0xff] %v2453_v61  ;;  %v2461_v63 = vld [vmem:[#allocation7 + $0x18] sm:$0xff] }
  0x3e   :  { %155 = vmatprep.subr.mxu0 %v2388_v40  ;;  %226 = vmatprep.subr.mxu1 %v2421_v51  ;;  %3352 = vst [vmem:[#allocation32_spill] sm:$0xff] %v2457_v62  ;;  %3353 = vst [vmem:[#allocation33_spill] sm:$0xff] %v2461_v63 }
  0x3f   :  { %156 = vmatpush1.msra.mxu0 %v2394_v42  ;;  %227 = vmatpush1.msra.mxu1 %v2427_v53 }
  0x40   :  { %157 = vmatprep.subr.mxu0 %v2400_v44  ;;  %228 = vmatprep.subr.mxu1 %v2433_v55 }
  0x41   :  { %158 = vmatpush1.msra.mxu0 %v2406_v46  ;;  %229 = vmatpush1.msra.mxu1 %v2439_v57 }
  0x42   :  { %159 = vmatprep.subr.mxu0 %v2412_v48  ;;  %230 = vmatprep.subr.mxu1 %v2445_v59 }
  0x43   :  { %160 = vmatpush1.msra.mxu0 %v2418_v50  ;;  %231 = vmatpush1.msra.mxu1 %v2449_v60 }
  0x44   :  { %161 = vmatprep.subr.mxu0 %v2424_v52  ;;  %232 = vmatprep.subr.mxu1 %v2453_v61 }
  0x45   :  { %162 = vmatpush1.msra.mxu0 %v2430_v54  ;;  %v2464_v54 = vld [vmem:[#allocation7 + $0x10] sm:$0xff]  ;;  %233 = vmatpush1.msra.mxu1 %v2457_v62 }
  0x46   :  { %163 = vmatprep.subr.mxu0 %v2436_v56  ;;  %3354 = vst [vmem:[#allocation34_spill] sm:$0xff] %v2464_v54  ;;  %234 = vmatprep.subr.mxu1 %v2461_v63 }
  0x47   :  { %164 = vmatpush1.msra.mxu0 %v2442_v58  ;;  %235 = vmatpush1.msra.mxu1 %v2464_v54 }
  0x48   :  { %198 = vmatmul.mubr.f32.vlgmr.msra.gmra.mxu0 %v3241_v0  ;;  %311 = vmatprep.subr.mxu0 %v2276_v1 }
  0x49   :  { %312 = vmatpush1.msra.mxu0 %v2278_v2  ;;  %269 = vmatmul.mubr.f32.vlgmr.msra.gmra.mxu1 %v3241_v0  ;;  %v3355_v0 = vld [vmem:[#allocation24_spill] sm:$0xff] }
  0x4a   :  { %313 = vmatprep.subr.mxu0 %v2280_v3  ;;  %382 = vmatprep.subr.mxu1 %v2297_v9 }
  0x4b   :  { %314 = vmatpush1.msra.mxu0 %v2283_v4  ;;  %383 = vmatpush1.msra.mxu1 %v2303_v11 }
  0x4c   :  { %315 = vmatprep.subr.mxu0 %v2286_v5  ;;  %384 = vmatprep.subr.mxu1 %v2309_v13 }
  0x4d   :  { %316 = vmatpush1.msra.mxu0 %v2289_v6  ;;  %385 = vmatpush1.msra.mxu1 %v2311_v14 }
  0x4e   :  { %317 = vmatprep.subr.mxu0 %v2292_v7  ;;  %386 = vmatprep.subr.mxu1 %v2317_v16 }
  0x4f   :  { %318 = vmatpush1.msra.mxu0 %v2295_v8  ;;  %387 = vmatpush1.msra.mxu1 %v2323_v18 }
  0x50   :  { %319 = vmatprep.subr.mxu0 %v2300_v10  ;;  %388 = vmatprep.subr.mxu1 %v2325_v19 }
  0x51   :  { %320 = vmatpush1.msra.mxu0 %v2306_v12  ;;  %389 = vmatpush1.msra.mxu1 %v2331_v21 }
  0x52   :  { %321 = vmatprep.subr.mxu0 %v2314_v15  ;;  %390 = vmatprep.subr.mxu1 %v2337_v23 }
  0x53   :  { %322 = vmatpush1.msra.mxu0 %v2320_v17  ;;  %391 = vmatpush1.msra.mxu1 %v2343_v25 }
  0x54   :  { %323 = vmatprep.subr.mxu0 %v2328_v20  ;;  %392 = vmatprep.subr.mxu1 %v2349_v27 }
  0x55   :  { %324 = vmatpush1.msra.mxu0 %v2334_v22  ;;  %393 = vmatpush1.msra.mxu1 %v2355_v29 }
  0x56   :  { %325 = vmatprep.subr.mxu0 %v2340_v24  ;;  %394 = vmatprep.subr.mxu1 %v2361_v31 }
  0x57   :  { %326 = vmatpush1.msra.mxu0 %v2346_v26  ;;  %395 = vmatpush1.msra.mxu1 %v2367_v33 }
  0x58   :  { %327 = vmatprep.subr.mxu0 %v2352_v28  ;;  %396 = vmatprep.subr.mxu1 %v2373_v35 }
  0x59   :  { %328 = vmatpush1.msra.mxu0 %v2358_v30  ;;  %397 = vmatpush1.msra.mxu1 %v2379_v37 }
  0x5a   :  { %329 = vmatprep.subr.mxu0 %v2364_v32  ;;  %398 = vmatprep.subr.mxu1 %v2385_v39 }
  0x5b   :  { %330 = vmatpush1.msra.mxu0 %v2370_v34  ;;  %399 = vmatpush1.msra.mxu1 %v2391_v41 }
  0x5c   :  { %331 = vmatprep.subr.mxu0 %v2376_v36  ;;  %400 = vmatprep.subr.mxu1 %v2397_v43 }
  0x5d   :  { %332 = vmatpush1.msra.mxu0 %v2382_v38  ;;  %401 = vmatpush1.msra.mxu1 %v2403_v45 }
  0x5e   :  { %333 = vmatprep.subr.mxu0 %v2388_v40  ;;  %402 = vmatprep.subr.mxu1 %v2409_v47 }
  0x5f   :  { %334 = vmatpush1.msra.mxu0 %v2394_v42  ;;  %403 = vmatpush1.msra.mxu1 %v2415_v49 }
  0x60   :  { %335 = vmatprep.subr.mxu0 %v2400_v44  ;;  %404 = vmatprep.subr.mxu1 %v2421_v51 }
  0x61   :  { %336 = vmatpush1.msra.mxu0 %v2406_v46  ;;  %405 = vmatpush1.msra.mxu1 %v2427_v53 }
  0x62   :  { %337 = vmatprep.subr.mxu0 %v2412_v48  ;;  %406 = vmatprep.subr.mxu1 %v2433_v55  ;;  %v3356_v48 = vmov 0.0  }
  0x63   :  { %338 = vmatpush1.msra.mxu0 %v2418_v50  ;;  %407 = vmatpush1.msra.mxu1 %v2439_v57 }
  0x64   :  { %339 = vmatprep.subr.mxu0 %v2424_v52  ;;  %408 = vmatprep.subr.mxu1 %v2445_v59  ;;  %v130_v52 = vld [vmem:[#allocation4 + $0x8] sm:$0xff] }
  0x65   :  { %340 = vmatpush1.msra.mxu0 %v3355_v0  ;;  %409 = vmatpush1.msra.mxu1 %v2449_v60  ;;  %v129_v0 = vld [vmem:[#allocation4] sm:$0xff] }
  0x66   :  { %341 = vmatprep.subr.mxu0 %v2436_v56  ;;  %410 = vmatprep.subr.mxu1 %v2453_v61 }
  0x67   :  { %342 = vmatpush1.msra.mxu0 %v2442_v58  ;;  %411 = vmatpush1.msra.mxu1 %v2457_v62 }
  0x68   :  { %375 = vmatprep.mubr.f32.mxu0 %v3356_v48  ;;  %412 = vmatprep.subr.mxu1 %v2461_v63  ;;  %v132_v63 = vld [vmem:[#allocation4 + $0x18] sm:$0xff] }
  0x69   :  { %446 = vmatprep.mubr.f32.mxu1 %v3356_v48  ;;  %413 = vmatpush1.msra.mxu1 %v2464_v54  ;;  %v131_v48 = vld [vmem:[#allocation4 + $0x10] sm:$0xff] }
  0x6a   :  { %491 = vmatprep.subr.mxu0 %v2276_v1  ;;  %562 = vmatprep.subr.mxu1 %v2297_v9 }
 0x108   :  { %v199_v56 = vpop.f32.mrf.mxu0 }
 0x109   :  { %v200_v61 = vadd.f32 %v199_v56, %v129_v0  ;;  %v270_v59 = vpop.f32.mrf.mxu1 }
 0x10a   :  { %v201_v60 = vpop.f32.mrf.mxu0  ;;  %v271_v54 = vadd.f32 %v270_v59, %v131_v48  ;;  %v3358_v59 = vld [vmem:[#allocation17_spill] sm:$0xff] }
 0x10b   :  { %v1843_v58 = vmul.f32 -1.442695, %v200_v61  ;;  %v202_v50 = vadd.f32 %v201_v60, %v130_v52  ;;  %v272_v57 = vpop.f32.mrf.mxu1 }
 0x10c   :  { %v273_v46 = vadd.f32 %v272_v57, %v132_v63  ;;  %v3360_v63 = vld [vmem:[#allocation18_spill] sm:$0xff] }
 0x10d   :  { %1938 = vpow2.f32 %v1843_v58  ;;  %v1844_v62 = vmul.f32 -1.442695, %v202_v50  ;;  %v299_v50 = vld [vmem:[%s3233_s1] sm:$0xff] }
 0x10e   :  { %v1845_v55 = vmul.f32 -1.442695, %v273_v46  ;;  %vm300_vm0 = vcmp.gt.f32.partialorder %v299_v50, 0.0  ;;  %v3365_v50 = vld [vmem:[#allocation30_spill] sm:$0xff] }
 0x10f   :  { %1940 = vpow2.f32 %v1844_v62  ;;  %v3359_v62 = vld [vmem:[#allocation25_spill] sm:$0xff] }
 0x110   :  { %1942 = vtanh.f32 %v271_v54 }
 0x111   :  { %1944 = vpow2.f32 %v1845_v55 }
 0x11a   :  { %v1939_v1 = vpop.eup %1938 }
 0x11b   :  { %v278_v44 = vadd.f32 1.0, %v1939_v1 }
 0x11c   :  { %v1941_v9 = vpop.eup %1940 }
 0x11d   :  { %1946 = vrcp.f32 %v278_v44  ;;  %v284_v0 = vadd.f32 1.0, %v1941_v9  ;;  %v1943_v56 = vpop.eup %1942 }
 0x11e   :  { %v1945_v52 = vpop.eup %1944 }
 0x11f   :  { %1948 = vrcp.f32 %v284_v0  ;;  %v291_v61 = vadd.f32 1.0, %v1945_v52  ;;  %v3361_v0 = vld [vmem:[#allocation27_spill] sm:$0xff]  ;;  %v3363_v52 = vld [vmem:[#allocation29_spill] sm:$0xff] }
 0x121   :  { %1950 = vrcp.f32 %v291_v61  ;;  %v3367_v61 = vld [vmem:[#allocation31_spill] sm:$0xff] }
 0x12a   :  { %v1947_v58 = vpop.eup %1946 }
 0x12b   :  { %v295_v48 = vmul.f32 %v1947_v58, %v1943_v56  ;;  %v3362_v56 = vld [vmem:[#allocation19_spill] sm:$0xff]  ;;  %v3364_v58 = vld [vmem:[#allocation20_spill] sm:$0xff] }
 0x12c   :  { %v1949_v60 = vpop.eup %1948 }
 0x12d   :  { %v294_v57 = vmul.f32 0.0, %v1949_v60  ;;  %v3366_v60 = vld [vmem:[#allocation22_spill] sm:$0xff] }
 0x12e   :  { %v1951_v44 = vpop.eup %1950 }
 0x12f   :  { %v296_v46 = vadd.f32 %v295_v48, %v294_v57  ;;  %v3368_v57 = vld [vmem:[#allocation24_spill] sm:$0xff] }
 0x130   :  { %v3369_v48 = vld [vmem:[#allocation32_spill] sm:$0xff] }
 0x131   :  { %1952 = vtanh.f32 %v296_v46  ;;  %v2541_v1 = vsel %vm300_vm0, %v296_v46, 0.0  ;;  %v3370_v46 = vld [vmem:[#allocation26_spill] sm:$0xff] }
 0x13e   :  { %v1953_v9 = vpop.eup %1952 }
 0x13f   :  { %v298_v54 = vmul.f32 %v1953_v9, %v1951_v44  ;;  %v3371_v44 = vld [vmem:[#allocation33_spill] sm:$0xff]  ;;  %v3372_v9 = vld [vmem:[#allocation28_spill] sm:$0xff] }
 0x141   :  { %1846 = vmatmul.mubr.msk.f32.vlgmr.msra.gmra.mxu0 %vm300_vm0, %v298_v54  ;;  %1847 = vmatmul.mubr.msk.f32.vlgmr.msra.gmra.mxu1 %vm300_vm0, %v298_v54  ;;  %v2543_v55 = vsel %vm300_vm0, %v298_v54, 0.0  ;;  %v3373_v54 = vmov 0.0  }
 0x142   :  { %3357 = vst [vmem:[#allocation35_spill] sm:$0xff] %v2543_v55  ;;  %492 = vmatpush1.msra.mxu0 %v2278_v2  ;;  %563 = vmatpush1.msra.mxu1 %v2303_v11 }
 0x143   :  { %493 = vmatprep.subr.mxu0 %v2280_v3  ;;  %564 = vmatprep.subr.mxu1 %v2309_v13 }
 0x144   :  { %494 = vmatpush1.msra.mxu0 %v2283_v4  ;;  %565 = vmatpush1.msra.mxu1 %v2311_v14 }
 0x145   :  { %495 = vmatprep.subr.mxu0 %v2286_v5  ;;  %566 = vmatprep.subr.mxu1 %v2317_v16 }
 0x146   :  { %496 = vmatpush1.msra.mxu0 %v2289_v6  ;;  %567 = vmatpush1.msra.mxu1 %v2323_v18 }
 0x147   :  { %497 = vmatprep.subr.mxu0 %v2292_v7  ;;  %568 = vmatprep.subr.mxu1 %v2325_v19 }
 0x148   :  { %498 = vmatpush1.msra.mxu0 %v2295_v8  ;;  %569 = vmatpush1.msra.mxu1 %v2331_v21 }
 0x149   :  { %499 = vmatprep.subr.mxu0 %v2300_v10  ;;  %570 = vmatprep.subr.mxu1 %v2337_v23 }
 0x14a   :  { %500 = vmatpush1.msra.mxu0 %v2306_v12  ;;  %571 = vmatpush1.msra.mxu1 %v2343_v25 }
 0x14b   :  { %501 = vmatprep.subr.mxu0 %v2314_v15  ;;  %572 = vmatprep.subr.mxu1 %v2349_v27 }
 0x14c   :  { %502 = vmatpush1.msra.mxu0 %v2320_v17  ;;  %573 = vmatpush1.msra.mxu1 %v2355_v29 }
 0x14d   :  { %503 = vmatprep.subr.mxu0 %v2328_v20  ;;  %574 = vmatprep.subr.mxu1 %v2361_v31 }
 0x14e   :  { %504 = vmatpush1.msra.mxu0 %v2334_v22  ;;  %575 = vmatpush1.msra.mxu1 %v2367_v33 }
 0x14f   :  { %505 = vmatprep.subr.mxu0 %v2340_v24  ;;  %576 = vmatprep.subr.mxu1 %v2373_v35 }
 0x150   :  { %506 = vmatpush1.msra.mxu0 %v2346_v26  ;;  %577 = vmatpush1.msra.mxu1 %v2379_v37 }
 0x151   :  { %507 = vmatprep.subr.mxu0 %v2352_v28  ;;  %578 = vmatprep.subr.mxu1 %v2385_v39 }
 0x152   :  { %508 = vmatpush1.msra.mxu0 %v2358_v30  ;;  %579 = vmatpush1.msra.mxu1 %v2391_v41 }
 0x153   :  { %509 = vmatprep.subr.mxu0 %v2364_v32  ;;  %580 = vmatprep.subr.mxu1 %v2397_v43 }
 0x154   :  { %510 = vmatpush1.msra.mxu0 %v2370_v34  ;;  %581 = vmatpush1.msra.mxu1 %v2403_v45 }
 0x155   :  { %511 = vmatprep.subr.mxu0 %v2376_v36  ;;  %582 = vmatprep.subr.mxu1 %v2409_v47 }
 0x156   :  { %512 = vmatpush1.msra.mxu0 %v2382_v38  ;;  %583 = vmatpush1.msra.mxu1 %v2415_v49 }
 0x157   :  { %513 = vmatprep.subr.mxu0 %v2388_v40  ;;  %584 = vmatprep.subr.mxu1 %v2421_v51 }
 0x158   :  { %514 = vmatpush1.msra.mxu0 %v2394_v42  ;;  %585 = vmatpush1.msra.mxu1 %v2427_v53 }
 0x159   :  { %515 = vmatprep.subr.mxu0 %v3358_v59  ;;  %586 = vmatprep.subr.mxu1 %v3359_v62  ;;  %v309_v59 = vld [vmem:[#allocation4 + $0x30] sm:$0xff] }
 0x15a   :  { %516 = vmatpush1.msra.mxu0 %v3360_v63  ;;  %587 = vmatpush1.msra.mxu1 %v3361_v0  ;;  %v310_v63 = vld [vmem:[#allocation4 + $0x38] sm:$0xff] }
 0x15b   :  { %517 = vmatprep.subr.mxu0 %v3362_v56  ;;  %588 = vmatprep.subr.mxu1 %v3363_v52  ;;  %v3374_v52 = vld [vmem:[#allocation34_spill] sm:$0xff] }
 0x15c   :  { %518 = vmatpush1.msra.mxu0 %v3364_v58  ;;  %589 = vmatpush1.msra.mxu1 %v3365_v50  ;;  %v3375_v50 = vld [vmem:[#allocation14_spill] sm:$0xff]  ;;  %v308_v58 = vld [vmem:[#allocation4 + $0x28] sm:$0xff] }
 0x15d   :  { %519 = vmatprep.subr.mxu0 %v3366_v60  ;;  %590 = vmatprep.subr.mxu1 %v3367_v61  ;;  %v3376_v60 = vld [vmem:[#allocation15_spill] sm:$0xff]  ;;  %v307_v61 = vld [vmem:[#allocation4 + $0x20] sm:$0xff] }
 0x15e   :  { %520 = vmatpush1.msra.mxu0 %v3368_v57  ;;  %591 = vmatpush1.msra.mxu1 %v3369_v48 }
 0x15f   :  { %521 = vmatprep.subr.mxu0 %v3370_v46  ;;  %592 = vmatprep.subr.mxu1 %v3371_v44 }
 0x160   :  { %522 = vmatpush1.msra.mxu0 %v3372_v9  ;;  %555 = vmatprep.mubr.f32.mxu0 %v3373_v54 }
 0x161   :  { %593 = vmatpush1.msra.mxu1 %v3374_v52  ;;  %626 = vmatprep.mubr.f32.mxu1 %v3373_v54 }
 0x162   :  { %671 = vmatprep.subr.mxu0 %v3375_v50  ;;  %742 = vmatprep.subr.mxu1 %v3376_v60 }
 0x201   :  { %v377_v57 = vpop.f32.mrf.mxu0  ;;  %v448_v44 = vpop.f32.mrf.mxu1 }
 0x202   :  { %v378_v48 = vadd.f32 %v377_v57, %v307_v61  ;;  %v449_v50 = vadd.f32 %v448_v44, %v309_v59  ;;  %v3381_v44 = vld [vmem:[#allocation17_spill] sm:$0xff] }
 0x203   :  { %v379_v56 = vpop.f32.mrf.mxu0  ;;  %v450_v62 = vpop.f32.mrf.mxu1 }
 0x204   :  { %v1848_v46 = vmul.f32 -1.442695, %v378_v48  ;;  %v380_v0 = vadd.f32 %v379_v56, %v308_v58  ;;  %v451_v52 = vadd.f32 %v450_v62, %v310_v63  ;;  %v3379_v48 = vld [vmem:[#allocation16_spill] sm:$0xff] }
 0x206   :  { %1954 = vpow2.f32 %v1848_v46  ;;  %v1849_v9 = vmul.f32 -1.442695, %v380_v0  ;;  %v1850_v54 = vmul.f32 -1.442695, %v451_v52  ;;  %v1851_v0 = vld [vmem:[%s3233_s1 + $0x8] sm:$0xff] }
 0x207   :  { %vm479_vm1 = vcmp.gt.f32.partialorder %v1851_v0, 0.0  ;;  %v3380_v46 = vld [vmem:[#allocation23_spill] sm:$0xff]  ;;  %v3387_v0 = vld [vmem:[#allocation20_spill] sm:$0xff] }
 0x208   :  { %1956 = vpow2.f32 %v1849_v9  ;;  %v3382_v9 = vld [vmem:[#allocation25_spill] sm:$0xff] }
 0x209   :  { %1958 = vpow2.f32 %v1850_v54  ;;  %v3383_v54 = vld [vmem:[#allocation18_spill] sm:$0xff] }
 0x213   :  { %v1955_v53 = vpop.eup %1954 }
 0x214   :  { %v456_v42 = vadd.f32 1.0, %v1955_v53 }
 0x215   :  { %v1957_v60 = vpop.eup %1956 }
 0x216   :  { %1960 = vrcp.f32 %v456_v42  ;;  %v462_v51 = vadd.f32 1.0, %v1957_v60  ;;  %v1959_v61 = vpop.eup %1958 }
 0x217   :  { %1962 = vtanh.f32 %v449_v50  ;;  %v469_v62 = vadd.f32 1.0, %v1959_v61  ;;  %v3384_v61 = vld [vmem:[#allocation27_spill] sm:$0xff] }
 0x218   :  { %1964 = vrcp.f32 %v462_v51 }
 0x219   :  { %1966 = vrcp.f32 %v469_v62  ;;  %v3389_v62 = vld [vmem:[#allocation22_spill] sm:$0xff] }
 0x223   :  { %v1961_v56 = vpop.eup %1960 }
 0x224   :  { %v1963_v58 = vpop.eup %1962 }
 0x225   :  { %v1965_v57 = vpop.eup %1964  ;;  %v473_v63 = vmul.f32 %v1963_v58, %v1961_v56  ;;  %v3385_v56 = vld [vmem:[#allocation19_spill] sm:$0xff]  ;;  %v3386_v58 = vld [vmem:[#allocation29_spill] sm:$0xff] }
 0x226   :  { %v472_v52 = vmul.f32 %v1965_v57, %v2541_v1  ;;  %v1967_v51 = vpop.eup %1966  ;;  %v3388_v57 = vld [vmem:[#allocation30_spill] sm:$0xff] }
 0x228   :  { %v474_v53 = vadd.f32 %v473_v63, %v472_v52  ;;  %v3390_v63 = vld [vmem:[#allocation31_spill] sm:$0xff]  ;;  %v3391_v52 = vld [vmem:[#allocation24_spill] sm:$0xff] }
 0x22a   :  { %1968 = vtanh.f32 %v474_v53  ;;  %v2616_v42 = vsel %vm479_vm1, %v474_v53, %v2541_v1  ;;  %v3378_v1 = vld [vmem:[#allocation21_spill] sm:$0xff]  ;;  %v3392_v53 = vld [vmem:[#allocation32_spill] sm:$0xff] }
 0x237   :  { %v1969_v59 = vpop.eup %1968 }
 0x238   :  { %v476_v50 = vmul.f32 %v1969_v59, %v1967_v51  ;;  %v3393_v51 = vld [vmem:[#allocation26_spill] sm:$0xff]  ;;  %v3394_v59 = vld [vmem:[#allocation33_spill] sm:$0xff] }
 0x23a   :  { %v2619_v60 = vsel %vm479_vm1, %v476_v50, %v2543_v55  ;;  %v3395_v50 = vld [vmem:[#allocation28_spill] sm:$0xff]  ;;  %v3396_v55 = vmov 0.0  }
 0x23b   :  { %3377 = vst [vmem:[#allocation36_spill] sm:$0xff] %v2619_v60  ;;  %556 = vmatmul.mubr.f32.vlgmr.msra.gmra.mxu0 %v2619_v60  ;;  %627 = vmatmul.mubr.f32.vlgmr.msra.gmra.mxu1 %v2619_v60 }
 0x23c   :  { %672 = vmatpush1.msra.mxu0 %v2278_v2  ;;  %743 = vmatpush1.msra.mxu1 %v2303_v11 }
 0x23d   :  { %673 = vmatprep.subr.mxu0 %v2280_v3  ;;  %744 = vmatprep.subr.mxu1 %v2309_v13 }
 0x23e   :  { %674 = vmatpush1.msra.mxu0 %v2283_v4  ;;  %745 = vmatpush1.msra.mxu1 %v2311_v14 }
 0x23f   :  { %675 = vmatprep.subr.mxu0 %v2286_v5  ;;  %746 = vmatprep.subr.mxu1 %v2317_v16 }
 0x240   :  { %676 = vmatpush1.msra.mxu0 %v2289_v6  ;;  %747 = vmatpush1.msra.mxu1 %v2323_v18 }
 0x241   :  { %677 = vmatprep.subr.mxu0 %v2292_v7  ;;  %748 = vmatprep.subr.mxu1 %v2325_v19 }
 0x242   :  { %678 = vmatpush1.msra.mxu0 %v2295_v8  ;;  %749 = vmatpush1.msra.mxu1 %v2331_v21 }
 0x243   :  { %679 = vmatprep.subr.mxu0 %v2300_v10  ;;  %750 = vmatprep.subr.mxu1 %v2337_v23 }
 0x244   :  { %680 = vmatpush1.msra.mxu0 %v2306_v12  ;;  %751 = vmatpush1.msra.mxu1 %v2343_v25 }
 0x245   :  { %681 = vmatprep.subr.mxu0 %v2314_v15  ;;  %752 = vmatprep.subr.mxu1 %v2349_v27 }
 0x246   :  { %682 = vmatpush1.msra.mxu0 %v2320_v17  ;;  %753 = vmatpush1.msra.mxu1 %v2355_v29 }
 0x247   :  { %683 = vmatprep.subr.mxu0 %v2328_v20  ;;  %754 = vmatprep.subr.mxu1 %v2361_v31 }
 0x248   :  { %684 = vmatpush1.msra.mxu0 %v2334_v22  ;;  %755 = vmatpush1.msra.mxu1 %v2367_v33 }
 0x249   :  { %685 = vmatprep.subr.mxu0 %v2340_v24  ;;  %756 = vmatprep.subr.mxu1 %v2373_v35 }
 0x24a   :  { %686 = vmatpush1.msra.mxu0 %v2346_v26  ;;  %757 = vmatpush1.msra.mxu1 %v2379_v37 }
 0x24b   :  { %687 = vmatprep.subr.mxu0 %v2352_v28  ;;  %758 = vmatprep.subr.mxu1 %v2385_v39 }
 0x24c   :  { %688 = vmatpush1.msra.mxu0 %v2358_v30  ;;  %759 = vmatpush1.msra.mxu1 %v2391_v41 }
 0x24d   :  { %689 = vmatprep.subr.mxu0 %v2364_v32  ;;  %760 = vmatprep.subr.mxu1 %v2397_v43 }
 0x24e   :  { %690 = vmatpush1.msra.mxu0 %v2370_v34  ;;  %761 = vmatpush1.msra.mxu1 %v2403_v45 }
 0x24f   :  { %691 = vmatprep.subr.mxu0 %v2376_v36  ;;  %762 = vmatprep.subr.mxu1 %v2409_v47 }
 0x250   :  { %692 = vmatpush1.msra.mxu0 %v2382_v38  ;;  %763 = vmatpush1.msra.mxu1 %v2415_v49 }
 0x251   :  { %693 = vmatprep.subr.mxu0 %v2388_v40  ;;  %764 = vmatprep.subr.mxu1 %v3378_v1 }
 0x252   :  { %694 = vmatpush1.msra.mxu0 %v3379_v48  ;;  %765 = vmatpush1.msra.mxu1 %v3380_v46 }
 0x253   :  { %695 = vmatprep.subr.mxu0 %v3381_v44  ;;  %766 = vmatprep.subr.mxu1 %v3382_v9 }
 0x254   :  { %696 = vmatpush1.msra.mxu0 %v3383_v54  ;;  %767 = vmatpush1.msra.mxu1 %v3384_v61 }
 0x255   :  { %697 = vmatprep.subr.mxu0 %v3385_v56  ;;  %768 = vmatprep.subr.mxu1 %v3386_v58  ;;  %v3397_v58 = vld [vmem:[#allocation34_spill] sm:$0xff]  ;;  %v490_v56 = vld [vmem:[#allocation4 + $0x58] sm:$0xff] }
 0x256   :  { %698 = vmatpush1.msra.mxu0 %v3387_v0  ;;  %769 = vmatpush1.msra.mxu1 %v3388_v57  ;;  %v3398_v57 = vld [vmem:[#allocation14_spill] sm:$0xff] }
 0x257   :  { %699 = vmatprep.subr.mxu0 %v3389_v62  ;;  %770 = vmatprep.subr.mxu1 %v3390_v63  ;;  %v3399_v62 = vld [vmem:[#allocation15_spill] sm:$0xff]  ;;  %v2224_v63 = vmov 0  }
 0x258   :  { %700 = vmatpush1.msra.mxu0 %v3391_v52  ;;  %771 = vmatpush1.msra.mxu1 %v3392_v53 }
 0x259   :  { %701 = vmatprep.subr.mxu0 %v3393_v51  ;;  %772 = vmatprep.subr.mxu1 %v3394_v59  ;;  %v1621_v51 = vld [vmem:[%s3234_s2 + $0x8] sm:$0xff] }
 0x25a   :  { %702 = vmatpush1.msra.mxu0 %v3395_v50  ;;  %735 = vmatprep.mubr.f32.mxu0 %v3396_v55  ;;  %v1625_v50 = vld [vmem:[%s3234_s2 + $0x28] sm:$0xff] }
 0x25b   :  { %773 = vmatpush1.msra.mxu1 %v3397_v58  ;;  %806 = vmatprep.mubr.f32.mxu1 %v3396_v55  ;;  %v1626_v58 = vld [vmem:[%s3234_s2 + $0x30] sm:$0xff]  ;;  %v488_v59 = vld [vmem:[#allocation4 + $0x48] sm:$0xff] }
 0x25c   :  { %851 = vmatprep.subr.mxu0 %v3398_v57  ;;  %922 = vmatprep.subr.mxu1 %v3399_v62  ;;  %v1627_v57 = vld [vmem:[%s3234_s2 + $0x38] sm:$0xff]  ;;  %v487_v62 = vld [vmem:[#allocation4 + $0x40] sm:$0xff] }
 0x25d   :  { %1937 = vset.pattern.permute.xlu1 %v2224_v63  ;;  %1936 = vset.pattern.permute.xlu0 %v2224_v63 }
 0x25e   :  { %1635 = vperm.xlu1 %1937, %v1621_v51  }
 0x262   :  { %1655 = vperm.xlu1 %1937, %v1625_v50  }
 0x266   :  { %1660 = vperm.xlu1 %1937, %v1626_v58   ;;  %v489_v58 = vld [vmem:[#allocation4 + $0x50] sm:$0xff] }
 0x26a   :  { %1665 = vperm.xlu1 %1937, %v1627_v57  }
 0x2fb   :  { %v557_v55 = vpop.f32.mrf.mxu0  ;;  %v628_v0 = vpop.f32.mrf.mxu1 }
 0x2fc   :  { %v558_v63 = vadd.f32 %v557_v55, %v487_v62  ;;  %v629_v46 = vadd.f32 %v628_v0, %v489_v58 }
 0x2fd   :  { %v559_v51 = vpop.f32.mrf.mxu0  ;;  %v630_v61 = vpop.f32.mrf.mxu1 }
 0x2fe   :  { %v1852_v53 = vmul.f32 -1.442695, %v558_v63  ;;  %v560_v52 = vadd.f32 %v559_v51, %v488_v59  ;;  %v631_v54 = vadd.f32 %v630_v61, %v490_v56  ;;  %v1859_v63 = vld [vmem:[%s3233_s1 + $0x18] sm:$0xff] }
 0x2ff   :  { %vm839_vm3 = vcmp.gt.f32.partialorder %v1859_v63, 0.0  ;;  %v2944_v63 = vld [vmem:[#allocation7 + $0x90] sm:$0xff] }
 0x300   :  { %1970 = vpow2.f32 %v1852_v53  ;;  %v1853_v50 = vmul.f32 -1.442695, %v560_v52  ;;  %v1854_v9 = vmul.f32 -1.442695, %v631_v54  ;;  %v1855_v52 = vld [vmem:[%s3233_s1 + $0x10] sm:$0xff] }
 0x301   :  { %vm659_vm2 = vcmp.gt.f32.partialorder %v1855_v52, 0.0 }
 0x302   :  { %1972 = vpow2.f32 %v1853_v50 }
 0x303   :  { %1974 = vpow2.f32 %v1854_v9 }
 0x30d   :  { %v1971_v44 = vpop.eup %1970 }
 0x30e   :  { %v636_v48 = vadd.f32 1.0, %v1971_v44 }
 0x30f   :  { %v1973_v57 = vpop.eup %1972 }
 0x310   :  { %1976 = vrcp.f32 %v636_v48  ;;  %v642_v1 = vadd.f32 1.0, %v1973_v57  ;;  %v1975_v55 = vpop.eup %1974 }
 0x311   :  { %1978 = vtanh.f32 %v629_v46  ;;  %v649_v61 = vadd.f32 1.0, %v1975_v55 }
 0x312   :  { %1980 = vrcp.f32 %v642_v1 }
 0x313   :  { %1982 = vrcp.f32 %v649_v61  ;;  %v1624_v61 = vld [vmem:[%s3234_s2 + $0x20] sm:$0xff] }
 0x31d   :  { %v1977_v59 = vpop.eup %1976 }
 0x31e   :  { %v1979_v53 = vpop.eup %1978 }
 0x31f   :  { %v1981_v62 = vpop.eup %1980  ;;  %v653_v56 = vmul.f32 %v1979_v53, %v1977_v59  ;;  %v1620_v53 = vld [vmem:[%s3234_s2] sm:$0xff] }
 0x320   :  { %v652_v54 = vmul.f32 %v1981_v62, %v2616_v42  ;;  %v1983_v1 = vpop.eup %1982  ;;  %1630 = vperm.xlu0 %1936, %v1620_v53   ;;  %v2962_v53 = vld [vmem:[#allocation7 + $0x58] sm:$0xff] }
 0x322   :  { %v654_v44 = vadd.f32 %v653_v56, %v652_v54 }
 0x324   :  { %1984 = vtanh.f32 %v654_v44  ;;  %v2706_v48 = vsel %vm659_vm2, %v654_v44, %v2616_v42  ;;  %1650 = vperm.xlu0 %1936, %v1624_v61   ;;  %v2805_v44 = vld [vmem:[#allocation7 + $0x1e0] sm:$0xff]  ;;  %v2971_v61 = vld [vmem:[#allocation7 + $0x28] sm:$0xff] }
 0x331   :  { %v1985_v46 = vpop.eup %1984 }
 0x332   :  { %v656_v9 = vmul.f32 %v1985_v46, %v1983_v1  ;;  %v2811_v1 = vld [vmem:[#allocation7 + $0x1c8] sm:$0xff]  ;;  %v2814_v46 = vld [vmem:[#allocation7 + $0x1d8] sm:$0xff] }
 0x334   :  { %v2709_v0 = vsel %vm659_vm2, %v656_v9, %v2619_v60  ;;  %v2817_v9 = vld [vmem:[#allocation7 + $0x1c0] sm:$0xff] }
 0x335   :  { %3400 = vst [vmem:[#allocation14_spill] sm:$0xff] %v2709_v0  ;;  %1598 = vrot.lane.b32.xlu1 %v2709_v0, %s2225_s27  ;;  %736 = vmatmul.mubr.f32.vlgmr.msra.gmra.mxu0 %v2709_v0 }
 0x336   :  { %807 = vmatmul.mubr.f32.vlgmr.msra.gmra.mxu1 %v2709_v0  ;;  %852 = vmatpush1.msra.mxu0 %v2278_v2  ;;  %v3401_v2 = vld [vmem:[#allocation21_spill] sm:$0xff] }
 0x337   :  { %923 = vmatpush1.msra.mxu1 %v2303_v11  ;;  %853 = vmatprep.subr.mxu0 %v2280_v3  ;;  %v3402_v3 = vld [vmem:[#allocation16_spill] sm:$0xff]  ;;  %v3409_v11 = vld [vmem:[#allocation29_spill] sm:$0xff] }
 0x338   :  { %924 = vmatprep.subr.mxu1 %v2309_v13  ;;  %854 = vmatpush1.msra.mxu0 %v2283_v4  ;;  %v3403_v4 = vld [vmem:[#allocation23_spill] sm:$0xff]  ;;  %v3411_v13 = vld [vmem:[#allocation30_spill] sm:$0xff] }
 0x339   :  { %925 = vmatpush1.msra.mxu1 %v2311_v14  ;;  %855 = vmatprep.subr.mxu0 %v2286_v5  ;;  %v3404_v5 = vld [vmem:[#allocation17_spill] sm:$0xff]  ;;  %v3412_v14 = vld [vmem:[#allocation22_spill] sm:$0xff] }
 0x33a   :  { %926 = vmatprep.subr.mxu1 %v2317_v16  ;;  %856 = vmatpush1.msra.mxu0 %v2289_v6  ;;  %v3405_v6 = vld [vmem:[#allocation25_spill] sm:$0xff]  ;;  %v3414_v16 = vld [vmem:[#allocation24_spill] sm:$0xff]  ;;  %3434 = vst [vmem:[#allocation22_spill] sm:$0xff] %v2962_v53 }
 0x33b   :  { %927 = vmatpush1.msra.mxu1 %v2323_v18  ;;  %857 = vmatprep.subr.mxu0 %v2292_v7  ;;  %v3406_v7 = vld [vmem:[#allocation18_spill] sm:$0xff] }
 0x33c   :  { %928 = vmatprep.subr.mxu1 %v2325_v19  ;;  %858 = vmatpush1.msra.mxu0 %v2295_v8  ;;  %v3407_v8 = vld [vmem:[#allocation27_spill] sm:$0xff]  ;;  %v3416_v18 = vld [vmem:[#allocation26_spill] sm:$0xff]  ;;  %v3417_v19 = vld [vmem:[#allocation33_spill] sm:$0xff]  ;;  %3428 = vst [vmem:[#allocation18_spill] sm:$0xff] %v2944_v63 }
 0x33d   :  { %929 = vmatpush1.msra.mxu1 %v2331_v21  ;;  %859 = vmatprep.subr.mxu0 %v2300_v10  ;;  %v3408_v10 = vld [vmem:[#allocation19_spill] sm:$0xff]  ;;  %v3419_v21 = vmov 0.0  }
 0x33e   :  { %930 = vmatprep.subr.mxu1 %v2337_v23  ;;  %860 = vmatpush1.msra.mxu0 %v2306_v12  ;;  %v3410_v12 = vld [vmem:[#allocation20_spill] sm:$0xff]  ;;  %v2779_v23 = vld [vmem:[#allocation7 + $0x1e8] sm:$0xff] }
 0x33f   :  { %931 = vmatpush1.msra.mxu1 %v2343_v25  ;;  %861 = vmatprep.subr.mxu0 %v2314_v15  ;;  %v3413_v15 = vld [vmem:[#allocation31_spill] sm:$0xff]  ;;  %3421 = vst [vmem:[#allocation15_spill] sm:$0xff] %v2779_v23  ;;  %v667_v25 = vld [vmem:[#allocation4 + $0x60] sm:$0xff] }
 0x340   :  { %932 = vmatprep.subr.mxu1 %v2349_v27  ;;  %862 = vmatpush1.msra.mxu0 %v2320_v17  ;;  %v3415_v17 = vld [vmem:[#allocation32_spill] sm:$0xff]  ;;  %v668_v27 = vld [vmem:[#allocation4 + $0x68] sm:$0xff] }
 0x341   :  { %933 = vmatpush1.msra.mxu1 %v2355_v29  ;;  %863 = vmatprep.subr.mxu0 %v2328_v20  ;;  %v3418_v20 = vld [vmem:[#allocation28_spill] sm:$0xff]  ;;  %3437 = vst [vmem:[#allocation32_spill] sm:$0xff] %v2971_v61 }
 0x342   :  { %934 = vmatprep.subr.mxu1 %v2361_v31  ;;  %864 = vmatpush1.msra.mxu0 %v2334_v22  ;;  %v3420_v22 = vld [vmem:[#allocation34_spill] sm:$0xff] }
 0x343   :  { %935 = vmatpush1.msra.mxu1 %v2367_v33  ;;  %865 = vmatprep.subr.mxu0 %v2340_v24  ;;  %v2782_v24 = vld [vmem:[#allocation7 + $0x1f8] sm:$0xff] }
 0x344   :  { %936 = vmatprep.subr.mxu1 %v2373_v35  ;;  %866 = vmatpush1.msra.mxu0 %v2346_v26  ;;  %3422 = vst [vmem:[#allocation21_spill] sm:$0xff] %v2782_v24 }
 0x345   :  { %937 = vmatpush1.msra.mxu1 %v2379_v37  ;;  %867 = vmatprep.subr.mxu0 %v2352_v28  ;;  %v669_v37 = vld [vmem:[#allocation4 + $0x70] sm:$0xff] }
 0x346   :  { %938 = vmatprep.subr.mxu1 %v2385_v39  ;;  %868 = vmatpush1.msra.mxu0 %v2358_v30 }
 0x347   :  { %939 = vmatpush1.msra.mxu1 %v2391_v41  ;;  %869 = vmatprep.subr.mxu0 %v2364_v32 }
 0x348   :  { %940 = vmatprep.subr.mxu1 %v2397_v43  ;;  %870 = vmatpush1.msra.mxu0 %v2370_v34  ;;  %v670_v34 = vld [vmem:[#allocation4 + $0x78] sm:$0xff] }
 0x349   :  { %941 = vmatpush1.msra.mxu1 %v2403_v45  ;;  %871 = vmatprep.subr.mxu0 %v2376_v36 }
 0x34a   :  { %942 = vmatprep.subr.mxu1 %v2409_v47  ;;  %872 = vmatpush1.msra.mxu0 %v2382_v38 }
 0x34b   :  { %943 = vmatpush1.msra.mxu1 %v2415_v49  ;;  %873 = vmatprep.subr.mxu0 %v2388_v40 }
 0x34c   :  { %944 = vmatprep.subr.mxu1 %v3401_v2  ;;  %874 = vmatpush1.msra.mxu0 %v3402_v3  ;;  %v2822_v2 = vld [vmem:[#allocation7 + $0x1d0] sm:$0xff]  ;;  %v2825_v3 = vld [vmem:[#allocation7 + $0x1a8] sm:$0xff] }
 0x34d   :  { %945 = vmatpush1.msra.mxu1 %v3403_v4  ;;  %875 = vmatprep.subr.mxu0 %v3404_v5  ;;  %v2828_v4 = vld [vmem:[#allocation7 + $0x1b8] sm:$0xff]  ;;  %v2831_v5 = vld [vmem:[#allocation7 + $0x1a0] sm:$0xff] }
 0x34e   :  { %946 = vmatprep.subr.mxu1 %v3405_v6  ;;  %876 = vmatpush1.msra.mxu0 %v3406_v7  ;;  %v2834_v6 = vld [vmem:[#allocation7 + $0x1b0] sm:$0xff]  ;;  %v2837_v7 = vld [vmem:[#allocation7 + $0x188] sm:$0xff] }
 0x34f   :  { %947 = vmatpush1.msra.mxu1 %v3407_v8  ;;  %877 = vmatprep.subr.mxu0 %v3408_v10  ;;  %v2840_v8 = vld [vmem:[#allocation7 + $0x198] sm:$0xff]  ;;  %v3424_v10 = vld [vmem:[#allocation35_spill] sm:$0xff] }
 0x350   :  { %948 = vmatprep.subr.mxu1 %v3409_v11  ;;  %878 = vmatpush1.msra.mxu0 %v3410_v12  ;;  %v2845_v11 = vld [vmem:[#allocation7 + $0x180] sm:$0xff]  ;;  %v2848_v12 = vld [vmem:[#allocation7 + $0x190] sm:$0xff] }
 0x351   :  { %949 = vmatpush1.msra.mxu1 %v3411_v13  ;;  %879 = vmatprep.subr.mxu0 %v3412_v14  ;;  %v2851_v13 = vld [vmem:[#allocation7 + $0x168] sm:$0xff]  ;;  %v2854_v14 = vld [vmem:[#allocation7 + $0x178] sm:$0xff] }
 0x352   :  { %950 = vmatprep.subr.mxu1 %v3413_v15  ;;  %880 = vmatpush1.msra.mxu0 %v3414_v16  ;;  %v2857_v15 = vld [vmem:[#allocation7 + $0x160] sm:$0xff]  ;;  %v2860_v16 = vld [vmem:[#allocation7 + $0x170] sm:$0xff] }
 0x353   :  { %951 = vmatpush1.msra.mxu1 %v3415_v17  ;;  %881 = vmatprep.subr.mxu0 %v3416_v18  ;;  %v2863_v17 = vld [vmem:[#allocation7 + $0x148] sm:$0xff]  ;;  %v2866_v18 = vld [vmem:[#allocation7 + $0x158] sm:$0xff] }
 0x354   :  { %952 = vmatprep.subr.mxu1 %v3417_v19  ;;  %882 = vmatpush1.msra.mxu0 %v3418_v20  ;;  %v2869_v19 = vld [vmem:[#allocation7 + $0x140] sm:$0xff]  ;;  %v2872_v20 = vld [vmem:[#allocation7 + $0x150] sm:$0xff] }
 0x355   :  { %915 = vmatprep.mubr.f32.mxu0 %v3419_v21  ;;  %953 = vmatpush1.msra.mxu1 %v3420_v22  ;;  %v2875_v22 = vld [vmem:[#allocation7 + $0x128] sm:$0xff] }
 0x356   :  { %986 = vmatprep.mubr.f32.mxu1 %v3419_v21  ;;  %1031 = vmatprep.subr.mxu0 %v2779_v23 }
 0x357   :  { %1102 = vmatprep.subr.mxu1 %v2782_v24 }
 0x3f5   :  { %v737_v26 = vpop.f32.mrf.mxu0 }
 0x3f6   :  { %v738_v28 = vadd.f32 %v737_v26, %v667_v25  ;;  %v808_v32 = vpop.f32.mrf.mxu1  ;;  %v2878_v25 = vld [vmem:[#allocation7 + $0x138] sm:$0xff]  ;;  %v2881_v26 = vld [vmem:[#allocation7 + $0x120] sm:$0xff] }
 0x3f7   :  { %v739_v29 = vpop.f32.mrf.mxu0  ;;  %v809_v40 = vadd.f32 %v808_v32, %v669_v37  ;;  %v2899_v32 = vld [vmem:[#allocation7 + $0xe8] sm:$0xff]  ;;  %v2914_v37 = vld [vmem:[#allocation7 + $0xd8] sm:$0xff] }
 0x3f8   :  { %v1856_v30 = vmul.f32 -1.442695, %v738_v28  ;;  %v740_v31 = vadd.f32 %v739_v29, %v668_v27  ;;  %v810_v35 = vpop.f32.mrf.mxu1  ;;  %v2884_v27 = vld [vmem:[#allocation7 + $0x130] sm:$0xff]  ;;  %v2887_v28 = vld [vmem:[#allocation7 + $0x108] sm:$0xff]  ;;  %v2890_v29 = vld [vmem:[#allocation7 + $0x118] sm:$0xff] }
 0x3f9   :  { %v811_v36 = vadd.f32 %v810_v35, %v670_v34  ;;  %v2905_v34 = vld [vmem:[#allocation7 + $0xe0] sm:$0xff]  ;;  %v2908_v35 = vld [vmem:[#allocation7 + $0xf0] sm:$0xff] }
 0x3fa   :  { %1986 = vpow2.f32 %v1856_v30  ;;  %v1857_v33 = vmul.f32 -1.442695, %v740_v31  ;;  %v2893_v30 = vld [vmem:[#allocation7 + $0x100] sm:$0xff]  ;;  %v2896_v31 = vld [vmem:[#allocation7 + $0x110] sm:$0xff] }
 0x3fb   :  { %v1858_v38 = vmul.f32 -1.442695, %v811_v36  ;;  %v2911_v36 = vld [vmem:[#allocation7 + $0xc8] sm:$0xff] }
 0x3fc   :  { %1988 = vpow2.f32 %v1857_v33  ;;  %v2902_v33 = vld [vmem:[#allocation7 + $0xf8] sm:$0xff] }
 0x3fd   :  { %1990 = vpow2.f32 %v1858_v38  ;;  %v2917_v38 = vld [vmem:[#allocation7 + $0xc0] sm:$0xff] }
 0x407   :  { %v1987_v39 = vpop.eup %1986 }
 0x408   :  { %v816_v41 = vadd.f32 1.0, %v1987_v39  ;;  %v2920_v39 = vld [vmem:[#allocation7 + $0xd0] sm:$0xff] }
 0x409   :  { %v1989_v43 = vpop.eup %1988 }
 0x40a   :  { %1992 = vrcp.f32 %v816_v41  ;;  %v822_v45 = vadd.f32 1.0, %v1989_v43  ;;  %v1991_v47 = vpop.eup %1990  ;;  %v2926_v41 = vld [vmem:[#allocation7 + $0xb8] sm:$0xff]  ;;  %v2929_v43 = vld [vmem:[#allocation7 + $0xa0] sm:$0xff] }
 0x40b   :  { %1994 = vtanh.f32 %v809_v40  ;;  %v829_v50 = vadd.f32 1.0, %v1991_v47  ;;  %v2923_v40 = vld [vmem:[#allocation7 + $0xa8] sm:$0xff] }
 0x40c   :  { %1996 = vrcp.f32 %v822_v45  ;;  %v2932_v45 = vld [vmem:[#allocation7 + $0xb0] sm:$0xff]  ;;  %v2935_v47 = vld [vmem:[#allocation7 + $0x88] sm:$0xff] }
 0x40d   :  { %1998 = vrcp.f32 %v829_v50  ;;  %3425 = vst [vmem:[#allocation23_spill] sm:$0xff] %v2935_v47  ;;  %v2950_v50 = vld [vmem:[#allocation7 + $0x78] sm:$0xff] }
 0x40e   :  { %3430 = vst [vmem:[#allocation19_spill] sm:$0xff] %v2950_v50 }
 0x417   :  { %v1993_v49 = vpop.eup %1992 }
 0x418   :  { %v1995_v42 = vpop.eup %1994 }
 0x419   :  { %v1997_v51 = vpop.eup %1996  ;;  %v833_v58 = vmul.f32 %v1995_v42, %v1993_v49  ;;  %v2938_v49 = vld [vmem:[#allocation7 + $0x98] sm:$0xff]  ;;  %v2941_v42 = vld [vmem:[#allocation7 + $0x80] sm:$0xff] }
 0x41a   :  { %v832_v57 = vmul.f32 %v1997_v51, %v2706_v48  ;;  %v1999_v52 = vpop.eup %1998  ;;  %3426 = vst [vmem:[#allocation17_spill] sm:$0xff] %v2938_v49  ;;  %3427 = vst [vmem:[#allocation25_spill] sm:$0xff] %v2941_v42  ;;  %v2947_v51 = vld [vmem:[#allocation7 + $0x68] sm:$0xff] }
 0x41b   :  { %3429 = vst [vmem:[#allocation27_spill] sm:$0xff] %v2947_v51 }
 0x41c   :  { %v834_v55 = vadd.f32 %v833_v58, %v832_v57  ;;  %v2953_v58 = vld [vmem:[#allocation7 + $0x60] sm:$0xff]  ;;  %v2956_v57 = vld [vmem:[#allocation7 + $0x70] sm:$0xff] }
 0x41d   :  { %3431 = vst [vmem:[#allocation29_spill] sm:$0xff] %v2953_v58  ;;  %3432 = vst [vmem:[#allocation20_spill] sm:$0xff] %v2956_v57 }
 0x41e   :  { %2000 = vtanh.f32 %v834_v55  ;;  %v2790_v59 = vsel %vm839_vm3, %v834_v55, %v2706_v48  ;;  %v2808_v48 = vld [vmem:[#allocation7 + $0x1f0] sm:$0xff]  ;;  %v2959_v55 = vld [vmem:[#allocation7 + $0x48] sm:$0xff] }
 0x41f   :  { %3433 = vst [vmem:[#allocation30_spill] sm:$0xff] %v2959_v55 }
 0x42b   :  { %v2001_v62 = vpop.eup %2000 }
 0x42c   :  { %v836_v56 = vmul.f32 %v2001_v62, %v1999_v52  ;;  %v2965_v52 = vld [vmem:[#allocation7 + $0x40] sm:$0xff]  ;;  %v2968_v62 = vld [vmem:[#allocation7 + $0x50] sm:$0xff] }
 0x42d   :  { %3435 = vst [vmem:[#allocation31_spill] sm:$0xff] %v2965_v52  ;;  %3436 = vst [vmem:[#allocation24_spill] sm:$0xff] %v2968_v62 }
 0x42e   :  { %v2799_v54 = vsel %vm839_vm3, %v836_v56, %v2709_v0  ;;  %v2974_v56 = vld [vmem:[#allocation7 + $0x38] sm:$0xff]  ;;  %v2977_v0 = vld [vmem:[#allocation7 + $0x20] sm:$0xff] }
 0x42f   :  { %3423 = vst [vmem:[#allocation16_spill] sm:$0xff] %v2799_v54  ;;  %1596 = vrot.lane.b32.xlu1 %v2799_v54, %s2225_s27  ;;  %916 = vmatmul.mubr.f32.vlgmr.msra.gmra.mxu0 %v2799_v54  ;;  %3438 = vst [vmem:[#allocation26_spill] sm:$0xff] %v2974_v56 }
 0x430   :  { %987 = vmatmul.mubr.f32.vlgmr.msra.gmra.mxu1 %v2799_v54  ;;  %1032 = vmatpush1.msra.mxu0 %v2805_v44  ;;  %3439 = vst [vmem:[#allocation33_spill] sm:$0xff] %v2977_v0 }
 0x431   :  { %1103 = vmatpush1.msra.mxu1 %v2808_v48  ;;  %1033 = vmatprep.subr.mxu0 %v2811_v1 }
 0x432   :  { %1104 = vmatprep.subr.mxu1 %v2814_v46  ;;  %1034 = vmatpush1.msra.mxu0 %v2817_v9 }
 0x433   :  { %1600 = vrot.lane.b32.xlu1 %v2619_v60, %s2225_s27  ;;  %1105 = vmatpush1.msra.mxu1 %v2822_v2  ;;  %v2983_v60 = vld [vmem:[#allocation7 + $0x8] sm:$0xff] }
 0x434   :  { %1035 = vmatprep.subr.mxu0 %v2825_v3  ;;  %1106 = vmatprep.subr.mxu1 %v2828_v4  ;;  %3441 = vst [vmem:[#allocation34_spill] sm:$0xff] %v2983_v60 }
 0x435   :  { %1036 = vmatpush1.msra.mxu0 %v2831_v5  ;;  %1107 = vmatpush1.msra.mxu1 %v2834_v6 }
 0x436   :  { %1037 = vmatprep.subr.mxu0 %v2837_v7  ;;  %1108 = vmatprep.subr.mxu1 %v2840_v8 }
 0x437   :  { %1602 = vrot.lane.b32.xlu1 %v3424_v10, %s2225_s27  ;;  %1038 = vmatpush1.msra.mxu0 %v2845_v11  ;;  %v2980_v10 = vld [vmem:[#allocation7 + $0x30] sm:$0xff] }
 0x438   :  { %1109 = vmatpush1.msra.mxu1 %v2848_v12  ;;  %1039 = vmatprep.subr.mxu0 %v2851_v13  ;;  %3440 = vst [vmem:[#allocation28_spill] sm:$0xff] %v2980_v10 }
 0x439   :  { %1110 = vmatprep.subr.mxu1 %v2854_v14  ;;  %1040 = vmatpush1.msra.mxu0 %v2857_v15 }
 0x43a   :  { %1111 = vmatpush1.msra.mxu1 %v2860_v16  ;;  %1041 = vmatprep.subr.mxu0 %v2863_v17 }
 0x43b   :  { %1112 = vmatprep.subr.mxu1 %v2866_v18  ;;  %1042 = vmatpush1.msra.mxu0 %v2869_v19 }
 0x43c   :  { %1113 = vmatpush1.msra.mxu1 %v2872_v20  ;;  %1043 = vmatprep.subr.mxu0 %v2875_v22 }
 0x43d   :  { %1114 = vmatprep.subr.mxu1 %v2878_v25  ;;  %1044 = vmatpush1.msra.mxu0 %v2881_v26 }
 0x43e   :  { %1115 = vmatpush1.msra.mxu1 %v2884_v27  ;;  %1045 = vmatprep.subr.mxu0 %v2887_v28 }
 0x43f   :  { %1116 = vmatprep.subr.mxu1 %v2890_v29  ;;  %1046 = vmatpush1.msra.mxu0 %v2893_v30 }
 0x440   :  { %1117 = vmatpush1.msra.mxu1 %v2896_v31  ;;  %1047 = vmatprep.subr.mxu0 %v2899_v32 }
 0x441   :  { %1118 = vmatprep.subr.mxu1 %v2902_v33  ;;  %1048 = vmatpush1.msra.mxu0 %v2905_v34 }
 0x442   :  { %1119 = vmatpush1.msra.mxu1 %v2908_v35  ;;  %1049 = vmatprep.subr.mxu0 %v2911_v36 }
 0x443   :  { %1120 = vmatprep.subr.mxu1 %v2914_v37  ;;  %1050 = vmatpush1.msra.mxu0 %v2917_v38 }
 0x444   :  { %1121 = vmatpush1.msra.mxu1 %v2920_v39  ;;  %1051 = vmatprep.subr.mxu0 %v2923_v40 }
 0x445   :  { %1122 = vmatprep.subr.mxu1 %v2926_v41  ;;  %1052 = vmatpush1.msra.mxu0 %v2929_v43 }
 0x446   :  { %1123 = vmatpush1.msra.mxu1 %v2932_v45  ;;  %1053 = vmatprep.subr.mxu0 %v2935_v47 }
 0x447   :  { %1124 = vmatprep.subr.mxu1 %v2938_v49  ;;  %1054 = vmatpush1.msra.mxu0 %v2941_v42 }
 0x448   :  { %1125 = vmatpush1.msra.mxu1 %v2944_v63  ;;  %1055 = vmatprep.subr.mxu0 %v2947_v51  ;;  %v849_v51 = vld [vmem:[#allocation4 + $0x90] sm:$0xff] }
 0x449   :  { %1126 = vmatprep.subr.mxu1 %v2950_v50  ;;  %1056 = vmatpush1.msra.mxu0 %v2953_v58  ;;  %v850_v58 = vld [vmem:[#allocation4 + $0x98] sm:$0xff] }
 0x44a   :  { %1127 = vmatpush1.msra.mxu1 %v2956_v57  ;;  %1057 = vmatprep.subr.mxu0 %v2959_v55 }
 0x44b   :  { %1128 = vmatprep.subr.mxu1 %v2962_v53  ;;  %1058 = vmatpush1.msra.mxu0 %v2965_v52 }
 0x44c   :  { %1129 = vmatpush1.msra.mxu1 %v2968_v62  ;;  %1059 = vmatprep.subr.mxu0 %v2971_v61  ;;  %v2986_v62 = vld [vmem:[#allocation7 + $0x18] sm:$0xff]  ;;  %v2989_v61 = vld [vmem:[#allocation7] sm:$0xff] }
 0x44d   :  { %1130 = vmatprep.subr.mxu1 %v2974_v56  ;;  %1060 = vmatpush1.msra.mxu0 %v2977_v0  ;;  %3442 = vst [vmem:[#allocation37_spill] sm:$0xff] %v2986_v62  ;;  %3443 = vst [vmem:[#allocation38_spill] sm:$0xff] %v2989_v61  ;;  %v2993_v56 = vld [vmem:[#allocation7 + $0x10] sm:$0xff]  ;;  %v848_v0 = vld [vmem:[#allocation4 + $0x88] sm:$0xff] }
 0x44e   :  { %1131 = vmatpush1.msra.mxu1 %v2980_v10  ;;  %1061 = vmatprep.subr.mxu0 %v2983_v60  ;;  %3444 = vst [vmem:[#allocation39_spill] sm:$0xff] %v2993_v56  ;;  %v847_v60 = vld [vmem:[#allocation4 + $0x80] sm:$0xff] }
 0x44f   :  { %1132 = vmatprep.subr.mxu1 %v2986_v62  ;;  %1062 = vmatpush1.msra.mxu0 %v2989_v61 }
 0x450   :  { %1095 = vmatprep.mubr.f32.mxu0 %v3419_v21  ;;  %1133 = vmatpush1.msra.mxu1 %v2993_v56 }
 0x451   :  { %1166 = vmatprep.mubr.f32.mxu1 %v3419_v21  ;;  %1211 = vmatprep.subr.mxu0 %v2779_v23 }
 0x452   :  { %1282 = vmatprep.subr.mxu1 %v2782_v24 }
 0x4ef   :  { %v917_v10 = vpop.f32.mrf.mxu0 }
 0x4f0   :  { %v918_v62 = vadd.f32 %v917_v10, %v847_v60  ;;  %v988_v61 = vpop.f32.mrf.mxu1 }
 0x4f1   :  { %v919_v52 = vpop.f32.mrf.mxu0  ;;  %v989_v23 = vadd.f32 %v988_v61, %v849_v51  ;;  %v3446_v51 = vld [vmem:[#allocation25_spill] sm:$0xff]  ;;  %v3449_v61 = vld [vmem:[#allocation19_spill] sm:$0xff] }
 0x4f2   :  { %v1860_v53 = vmul.f32 -1.442695, %v918_v62  ;;  %v920_v55 = vadd.f32 %v919_v52, %v848_v0  ;;  %v990_v50 = vpop.f32.mrf.mxu1  ;;  %v3447_v52 = vld [vmem:[#allocation18_spill] sm:$0xff]  ;;  %v3448_v62 = vld [vmem:[#allocation27_spill] sm:$0xff] }
 0x4f3   :  { %v991_v56 = vadd.f32 %v990_v50, %v850_v58 }
 0x4f4   :  { %2002 = vpow2.f32 %v1860_v53  ;;  %v1861_v57 = vmul.f32 -1.442695, %v920_v55 }
 0x4f5   :  { %v1862_v21 = vmul.f32 -1.442695, %v991_v56  ;;  %v3450_v56 = vld [vmem:[#allocation29_spill] sm:$0xff] }
 0x4f6   :  { %2004 = vpow2.f32 %v1861_v57  ;;  %v1863_v57 = vld [vmem:[%s3233_s1 + $0x20] sm:$0xff] }
 0x4f7   :  { %2006 = vpow2.f32 %v1862_v21  ;;  %vm1019_vm4 = vcmp.gt.f32.partialorder %v1863_v57, 0.0  ;;  %v3454_v57 = vld [vmem:[#allocation31_spill] sm:$0xff] }
 0x501   :  { %v2003_v63 = vpop.eup %2002 }
 0x502   :  { %v996_v42 = vadd.f32 1.0, %v2003_v63 }
 0x503   :  { %v2005_v24 = vpop.eup %2004 }
 0x504   :  { %2008 = vrcp.f32 %v996_v42  ;;  %v1002_v49 = vadd.f32 1.0, %v2005_v24  ;;  %v2007_v60 = vpop.eup %2006 }
 0x505   :  { %2010 = vtanh.f32 %v989_v23  ;;  %v1009_v50 = vadd.f32 1.0, %v2007_v60  ;;  %v3451_v60 = vld [vmem:[#allocation20_spill] sm:$0xff] }
 0x506   :  { %2012 = vrcp.f32 %v1002_v49 }
 0x507   :  { %2014 = vrcp.f32 %v1009_v50  ;;  %v3456_v50 = vld [vmem:[#allocation32_spill] sm:$0xff] }
 0x511   :  { %v2009_v0 = vpop.eup %2008 }
 0x512   :  { %v2011_v10 = vpop.eup %2010 }
 0x513   :  { %v2013_v55 = vpop.eup %2012  ;;  %v1013_v58 = vmul.f32 %v2011_v10, %v2009_v0  ;;  %v3452_v0 = vld [vmem:[#allocation30_spill] sm:$0xff] }
 0x514   :  { %v1012_v53 = vmul.f32 %v2013_v55, %v2790_v59  ;;  %v2015_v23 = vpop.eup %2014  ;;  %v3453_v10 = vld [vmem:[#allocation22_spill] sm:$0xff]  ;;  %v3455_v55 = vld [vmem:[#allocation24_spill] sm:$0xff] }
 0x516   :  { %v1014_v63 = vadd.f32 %v1013_v58, %v1012_v53  ;;  %v3457_v58 = vld [vmem:[#allocation26_spill] sm:$0xff]  ;;  %v3458_v53 = vld [vmem:[#allocation33_spill] sm:$0xff] }
 0x518   :  { %2016 = vtanh.f32 %v1014_v63  ;;  %v3004_v21 = vsel %vm1019_vm4, %v1014_v63, %v2790_v59  ;;  %v3445_v59 = vld [vmem:[#allocation17_spill] sm:$0xff]  ;;  %v3459_v63 = vld [vmem:[#allocation28_spill] sm:$0xff] }
 0x525   :  { %v2017_v24 = vpop.eup %2016 }
 0x526   :  { %v1016_v49 = vmul.f32 %v2017_v24, %v2015_v23  ;;  %v3460_v23 = vld [vmem:[#allocation34_spill] sm:$0xff]  ;;  %v3461_v24 = vld [vmem:[#allocation37_spill] sm:$0xff] }
 0x528   :  { %v3007_v42 = vsel %vm1019_vm4, %v1016_v49, %v2799_v54  ;;  %v3462_v49 = vld [vmem:[#allocation38_spill] sm:$0xff]  ;;  %v3463_v54 = vmov 0.0  }
 0x529   :  { %1096 = vmatmul.mubr.f32.vlgmr.msra.gmra.mxu0 %v3007_v42  ;;  %1167 = vmatmul.mubr.f32.vlgmr.msra.gmra.mxu1 %v3007_v42 }
 0x52a   :  { %1212 = vmatpush1.msra.mxu0 %v2805_v44  ;;  %1283 = vmatpush1.msra.mxu1 %v2808_v48 }
 0x52b   :  { %1213 = vmatprep.subr.mxu0 %v2811_v1  ;;  %1284 = vmatprep.subr.mxu1 %v2814_v46 }
 0x52c   :  { %1214 = vmatpush1.msra.mxu0 %v2817_v9  ;;  %1285 = vmatpush1.msra.mxu1 %v2822_v2 }
 0x52d   :  { %1215 = vmatprep.subr.mxu0 %v2825_v3  ;;  %1286 = vmatprep.subr.mxu1 %v2828_v4 }
 0x52e   :  { %1216 = vmatpush1.msra.mxu0 %v2831_v5  ;;  %1287 = vmatpush1.msra.mxu1 %v2834_v6 }
 0x52f   :  { %1217 = vmatprep.subr.mxu0 %v2837_v7  ;;  %1288 = vmatprep.subr.mxu1 %v2840_v8 }
 0x530   :  { %1218 = vmatpush1.msra.mxu0 %v2845_v11  ;;  %1289 = vmatpush1.msra.mxu1 %v2848_v12 }
 0x531   :  { %1219 = vmatprep.subr.mxu0 %v2851_v13  ;;  %1290 = vmatprep.subr.mxu1 %v2854_v14 }
 0x532   :  { %1220 = vmatpush1.msra.mxu0 %v2857_v15  ;;  %1291 = vmatpush1.msra.mxu1 %v2860_v16 }
 0x533   :  { %1221 = vmatprep.subr.mxu0 %v2863_v17  ;;  %1292 = vmatprep.subr.mxu1 %v2866_v18 }
 0x534   :  { %1222 = vmatpush1.msra.mxu0 %v2869_v19  ;;  %1293 = vmatpush1.msra.mxu1 %v2872_v20 }
 0x535   :  { %1223 = vmatprep.subr.mxu0 %v2875_v22  ;;  %1294 = vmatprep.subr.mxu1 %v2878_v25 }
 0x536   :  { %1224 = vmatpush1.msra.mxu0 %v2881_v26  ;;  %1295 = vmatpush1.msra.mxu1 %v2884_v27 }
 0x537   :  { %1225 = vmatprep.subr.mxu0 %v2887_v28  ;;  %1296 = vmatprep.subr.mxu1 %v2890_v29 }
 0x538   :  { %1226 = vmatpush1.msra.mxu0 %v2893_v30  ;;  %1297 = vmatpush1.msra.mxu1 %v2896_v31 }
 0x539   :  { %1227 = vmatprep.subr.mxu0 %v2899_v32  ;;  %1298 = vmatprep.subr.mxu1 %v2902_v33 }
 0x53a   :  { %1228 = vmatpush1.msra.mxu0 %v2905_v34  ;;  %1299 = vmatpush1.msra.mxu1 %v2908_v35 }
 0x53b   :  { %1229 = vmatprep.subr.mxu0 %v2911_v36  ;;  %1300 = vmatprep.subr.mxu1 %v2914_v37 }
 0x53c   :  { %1230 = vmatpush1.msra.mxu0 %v2917_v38  ;;  %1301 = vmatpush1.msra.mxu1 %v2920_v39 }
 0x53d   :  { %1231 = vmatprep.subr.mxu0 %v2923_v40  ;;  %1302 = vmatprep.subr.mxu1 %v2926_v41 }
 0x53e   :  { %1232 = vmatpush1.msra.mxu0 %v2929_v43  ;;  %1303 = vmatpush1.msra.mxu1 %v2932_v45 }
 0x53f   :  { %1233 = vmatprep.subr.mxu0 %v2935_v47  ;;  %1304 = vmatprep.subr.mxu1 %v3445_v59 }
 0x540   :  { %1234 = vmatpush1.msra.mxu0 %v3446_v51  ;;  %1305 = vmatpush1.msra.mxu1 %v3447_v52 }
 0x541   :  { %1235 = vmatprep.subr.mxu0 %v3448_v62  ;;  %1306 = vmatprep.subr.mxu1 %v3449_v61  ;;  %v1029_v61 = vld [vmem:[#allocation4 + $0xb0] sm:$0xff] }
 0x542   :  { %1236 = vmatpush1.msra.mxu0 %v3450_v56  ;;  %1307 = vmatpush1.msra.mxu1 %v3451_v60  ;;  %v1030_v60 = vld [vmem:[#allocation4 + $0xb8] sm:$0xff] }
 0x543   :  { %1237 = vmatprep.subr.mxu0 %v3452_v0  ;;  %1308 = vmatprep.subr.mxu1 %v3453_v10  ;;  %v3464_v0 = vld [vmem:[#allocation39_spill] sm:$0xff] }
 0x544   :  { %1238 = vmatpush1.msra.mxu0 %v3454_v57  ;;  %1309 = vmatpush1.msra.mxu1 %v3455_v55  ;;  %v3465_v57 = vld [vmem:[#allocation21_spill] sm:$0xff]  ;;  %v1028_v55 = vld [vmem:[#allocation4 + $0xa8] sm:$0xff] }
 0x545   :  { %1239 = vmatprep.subr.mxu0 %v3456_v50  ;;  %1310 = vmatprep.subr.mxu1 %v3457_v58  ;;  %v3466_v50 = vld [vmem:[#allocation15_spill] sm:$0xff]  ;;  %v1027_v58 = vld [vmem:[#allocation4 + $0xa0] sm:$0xff] }
 0x546   :  { %1240 = vmatpush1.msra.mxu0 %v3458_v53  ;;  %1311 = vmatpush1.msra.mxu1 %v3459_v63 }
 0x547   :  { %1241 = vmatprep.subr.mxu0 %v3460_v23  ;;  %1312 = vmatprep.subr.mxu1 %v3461_v24 }
 0x548   :  { %1242 = vmatpush1.msra.mxu0 %v3462_v49  ;;  %1275 = vmatprep.mubr.f32.mxu0 %v3463_v54 }
 0x549   :  { %1313 = vmatpush1.msra.mxu1 %v3464_v0  ;;  %1346 = vmatprep.mubr.f32.mxu1 %v3463_v54 }
 0x54a   :  { %1462 = vmatprep.subr.mxu1 %v3465_v57  ;;  %1391 = vmatprep.subr.mxu0 %v3466_v50 }
 0x5e9   :  { %v1097_v53 = vpop.f32.mrf.mxu0  ;;  %v1168_v24 = vpop.f32.mrf.mxu1 }
 0x5ea   :  { %v1098_v63 = vadd.f32 %v1097_v53, %v1027_v58  ;;  %v1169_v57 = vadd.f32 %v1168_v24, %v1029_v61 }
 0x5eb   :  { %v1099_v10 = vpop.f32.mrf.mxu0  ;;  %v1170_v62 = vpop.f32.mrf.mxu1 }
 0x5ec   :  { %v1864_v23 = vmul.f32 -1.442695, %v1098_v63  ;;  %v1100_v56 = vadd.f32 %v1099_v10, %v1028_v55  ;;  %v1171_v0 = vadd.f32 %v1170_v62, %v1030_v60 }
 0x5ee   :  { %2018 = vpow2.f32 %v1864_v23  ;;  %v1865_v49 = vmul.f32 -1.442695, %v1100_v56  ;;  %v1866_v54 = vmul.f32 -1.442695, %v1171_v0  ;;  %v1867_v56 = vld [vmem:[%s3233_s1 + $0x28] sm:$0xff] }
 0x5ef   :  { %vm1199_vm5 = vcmp.gt.f32.partialorder %v1867_v56, 0.0 }
 0x5f0   :  { %2020 = vpow2.f32 %v1865_v49 }
 0x5f1   :  { %2022 = vpow2.f32 %v1866_v54 }
 0x5fb   :  { %v2019_v51 = vpop.eup %2018 }
 0x5fc   :  { %v1176_v52 = vadd.f32 1.0, %v2019_v51 }
 0x5fd   :  { %v2021_v50 = vpop.eup %2020 }
 0x5fe   :  { %2024 = vrcp.f32 %v1176_v52  ;;  %v1182_v47 = vadd.f32 1.0, %v2021_v50  ;;  %v2023_v58 = vpop.eup %2022 }
 0x5ff   :  { %2026 = vtanh.f32 %v1169_v57  ;;  %v1189_v62 = vadd.f32 1.0, %v2023_v58  ;;  %v1871_v57 = vld [vmem:[%s3233_s1 + $0x30] sm:$0xff] }
 0x600   :  { %2028 = vrcp.f32 %v1182_v47  ;;  %vm1379_vm6 = vcmp.gt.f32.partialorder %v1871_v57, 0.0 }
 0x601   :  { %2030 = vrcp.f32 %v1189_v62 }
 0x60b   :  { %v2025_v10 = vpop.eup %2024 }
 0x60c   :  { %v2027_v55 = vpop.eup %2026 }
 0x60d   :  { %v2029_v53 = vpop.eup %2028  ;;  %v1193_v60 = vmul.f32 %v2027_v55, %v2025_v10 }
 0x60e   :  { %v1192_v0 = vmul.f32 %v2029_v53, %v3004_v21  ;;  %v2031_v47 = vpop.eup %2030 }
 0x610   :  { %v1194_v51 = vadd.f32 %v1193_v60, %v1192_v0 }
 0x612   :  { %2032 = vtanh.f32 %v1194_v51  ;;  %v3082_v54 = vsel %vm1199_vm5, %v1194_v51, %v3004_v21  ;;  %v3163_v21 = vpop.permute.xlu1 %1635  ;;  %v3174_v51 = vpop.permute.xlu0 %1630 }
 0x61f   :  { %v2033_v52 = vpop.eup %2032 }
 0x620   :  { %v1196_v61 = vmul.f32 %v2033_v52, %v2031_v47 }
 0x622   :  { %v3085_v63 = vsel %vm1199_vm5, %v1196_v61, %v3007_v42 }
 0x623   :  { %1276 = vmatmul.mubr.f32.vlgmr.msra.gmra.mxu0 %v3085_v63  ;;  %1347 = vmatmul.mubr.f32.vlgmr.msra.gmra.mxu1 %v3085_v63 }
 0x624   :  { %1463 = vmatpush1.msra.mxu1 %v2808_v48  ;;  %1392 = vmatpush1.msra.mxu0 %v2805_v44  ;;  %v3467_v44 = vld [vmem:[#allocation23_spill] sm:$0xff]  ;;  %v3468_v48 = vld [vmem:[#allocation18_spill] sm:$0xff] }
 0x625   :  { %1464 = vmatprep.subr.mxu1 %v2814_v46  ;;  %1393 = vmatprep.subr.mxu0 %v2811_v1  ;;  %v3469_v1 = vld [vmem:[#allocation25_spill] sm:$0xff]  ;;  %v3470_v46 = vld [vmem:[#allocation19_spill] sm:$0xff] }
 0x626   :  { %1465 = vmatpush1.msra.mxu1 %v2822_v2  ;;  %1394 = vmatpush1.msra.mxu0 %v2817_v9  ;;  %v3471_v9 = vld [vmem:[#allocation27_spill] sm:$0xff]  ;;  %v3472_v2 = vld [vmem:[#allocation20_spill] sm:$0xff] }
 0x627   :  { %1466 = vmatprep.subr.mxu1 %v2828_v4  ;;  %1395 = vmatprep.subr.mxu0 %v2825_v3  ;;  %v3473_v3 = vld [vmem:[#allocation29_spill] sm:$0xff]  ;;  %v3474_v4 = vld [vmem:[#allocation22_spill] sm:$0xff] }
 0x628   :  { %1467 = vmatpush1.msra.mxu1 %v2834_v6  ;;  %1396 = vmatpush1.msra.mxu0 %v2831_v5  ;;  %v3475_v5 = vld [vmem:[#allocation30_spill] sm:$0xff]  ;;  %v3476_v6 = vld [vmem:[#allocation24_spill] sm:$0xff] }
 0x629   :  { %1468 = vmatprep.subr.mxu1 %v2840_v8  ;;  %1397 = vmatprep.subr.mxu0 %v2837_v7  ;;  %v3477_v7 = vld [vmem:[#allocation31_spill] sm:$0xff]  ;;  %v3478_v8 = vld [vmem:[#allocation26_spill] sm:$0xff] }
 0x62a   :  { %1469 = vmatpush1.msra.mxu1 %v2848_v12  ;;  %1398 = vmatpush1.msra.mxu0 %v2845_v11  ;;  %v3479_v11 = vld [vmem:[#allocation32_spill] sm:$0xff] }
 0x62b   :  { %1470 = vmatprep.subr.mxu1 %v2854_v14  ;;  %1399 = vmatprep.subr.mxu0 %v2851_v13  ;;  %v3480_v12 = vld [vmem:[#allocation28_spill] sm:$0xff]  ;;  %v3481_v13 = vld [vmem:[#allocation33_spill] sm:$0xff] }
 0x62c   :  { %1471 = vmatpush1.msra.mxu1 %v2860_v16  ;;  %1400 = vmatpush1.msra.mxu0 %v2857_v15  ;;  %v3482_v14 = vld [vmem:[#allocation37_spill] sm:$0xff]  ;;  %v3483_v15 = vld [vmem:[#allocation34_spill] sm:$0xff]  ;;  %v3484_v16 = vld [vmem:[#allocation39_spill] sm:$0xff] }
 0x62d   :  { %1472 = vmatprep.subr.mxu1 %v2866_v18  ;;  %1401 = vmatprep.subr.mxu0 %v2863_v17  ;;  %v3485_v17 = vld [vmem:[#allocation38_spill] sm:$0xff]  ;;  %v3486_v18 = vmov 0.0  }
 0x62e   :  { %1473 = vmatpush1.msra.mxu1 %v2872_v20  ;;  %1402 = vmatpush1.msra.mxu0 %v2869_v19  ;;  %v1622_v19 = vld [vmem:[%s3234_s2 + $0x10] sm:$0xff]  ;;  %v3156_v20 = vld [vmem:[#allocation9 + $0x18] sm:$0xff] }
 0x62f   :  { %1474 = vmatprep.subr.mxu1 %v2878_v25  ;;  %1403 = vmatprep.subr.mxu0 %v2875_v22  ;;  %v1623_v22 = vld [vmem:[%s3234_s2 + $0x18] sm:$0xff]  ;;  %v1207_v25 = vld [vmem:[#allocation4 + $0xc0] sm:$0xff] }
 0x630   :  { %1475 = vmatpush1.msra.mxu1 %v2884_v27  ;;  %1404 = vmatpush1.msra.mxu0 %v2881_v26  ;;  %v1208_v27 = vld [vmem:[#allocation4 + $0xc8] sm:$0xff] }
 0x631   :  { %1476 = vmatprep.subr.mxu1 %v2890_v29  ;;  %1405 = vmatprep.subr.mxu0 %v2887_v28 }
 0x632   :  { %1477 = vmatpush1.msra.mxu1 %v2896_v31  ;;  %1406 = vmatpush1.msra.mxu0 %v2893_v30 }
 0x633   :  { %1478 = vmatprep.subr.mxu1 %v2902_v33  ;;  %1407 = vmatprep.subr.mxu0 %v2899_v32 }
 0x634   :  { %1479 = vmatpush1.msra.mxu1 %v2908_v35  ;;  %1408 = vmatpush1.msra.mxu0 %v2905_v34  ;;  %v1210_v34 = vld [vmem:[#allocation4 + $0xd8] sm:$0xff] }
 0x635   :  { %1480 = vmatprep.subr.mxu1 %v2914_v37  ;;  %1409 = vmatprep.subr.mxu0 %v2911_v36  ;;  %v1209_v37 = vld [vmem:[#allocation4 + $0xd0] sm:$0xff] }
 0x636   :  { %1481 = vmatpush1.msra.mxu1 %v2920_v39  ;;  %1410 = vmatpush1.msra.mxu0 %v2917_v38 }
 0x637   :  { %1482 = vmatprep.subr.mxu1 %v2926_v41  ;;  %1411 = vmatprep.subr.mxu0 %v2923_v40 }
 0x638   :  { %1483 = vmatpush1.msra.mxu1 %v2932_v45  ;;  %1412 = vmatpush1.msra.mxu0 %v2929_v43 }
 0x639   :  { %1484 = vmatprep.subr.mxu1 %v3445_v59  ;;  %1413 = vmatprep.subr.mxu0 %v3467_v44  ;;  %v1656_v59 = vpop.permute.xlu1 %1655 }
 0x63a   :  { %1485 = vmatpush1.msra.mxu1 %v3468_v48  ;;  %1414 = vmatpush1.msra.mxu0 %v3469_v1  ;;  %v1651_v48 = vpop.permute.xlu0 %1650 }
 0x63b   :  { %1486 = vmatprep.subr.mxu1 %v3470_v46  ;;  %1415 = vmatprep.subr.mxu0 %v3471_v9 }
 0x63c   :  { %1487 = vmatpush1.msra.mxu1 %v3472_v2  ;;  %1416 = vmatpush1.msra.mxu0 %v3473_v3  ;;  %v1677_v2 = vld [vmem:[#allocation9 + $0x8] sm:$0xff] }
 0x63d   :  { %1488 = vmatprep.subr.mxu1 %v3474_v4  ;;  %1417 = vmatprep.subr.mxu0 %v3475_v5  ;;  %v1661_v10 = vpop.permute.xlu1 %1660  ;;  %v1676_v5 = vld [vmem:[#allocation9] sm:$0xff] }
 0x63e   :  { %1489 = vmatpush1.msra.mxu1 %v3476_v6  ;;  %1418 = vmatpush1.msra.mxu0 %v3477_v7 }
 0x63f   :  { %1490 = vmatprep.subr.mxu1 %v3478_v8  ;;  %1419 = vmatprep.subr.mxu0 %v3479_v11  ;;  %v1387_v11 = vld [vmem:[#allocation4 + $0xe0] sm:$0xff] }
 0x640   :  { %1491 = vmatpush1.msra.mxu1 %v3480_v12  ;;  %1420 = vmatpush1.msra.mxu0 %v3481_v13  ;;  %v1388_v13 = vld [vmem:[#allocation4 + $0xe8] sm:$0xff] }
 0x641   :  { %1492 = vmatprep.subr.mxu1 %v3482_v14  ;;  %1421 = vmatprep.subr.mxu0 %v3483_v15  ;;  %v3172_v60 = vpop.permute.xlu1 %1665 }
 0x642   :  { %1493 = vmatpush1.msra.mxu1 %v3484_v16  ;;  %1422 = vmatpush1.msra.mxu0 %v3485_v17 }
 0x643   :  { %1455 = vmatprep.mubr.f32.mxu0 %v3486_v18  ;;  %1526 = vmatprep.mubr.f32.mxu1 %v3486_v18 }
 0x644   :  { %1640 = vperm.xlu0 %1936, %v1622_v19   ;;  %1917 = vmatprep.subr.mxu1 %v3156_v20 }
 0x645   :  { %1897 = vmatprep.subr.mxu0 %v3156_v20  ;;  %v1599_v0 = vpop.permute.xlu1 %1598 }
 0x646   :  { %v1617_v4 = vadd.f32 %v1599_v0, %v3085_v63 }
 0x648   :  { %1645 = vperm.xlu0 %1936, %v1623_v22   ;;  %v1673_v7 = vmul.f32 %v1656_v59, %v1617_v4  ;;  %v3194_v22 = vld [vmem:[%s3237_s5] ss:$0 sm:$0xff] }
 0x649   :  { %v1597_v52 = vpop.permute.xlu1 %1596 }
 0x64a   :  { %v1616_v44 = vadd.f32 %v1597_v52, %v3007_v42 }
 0x64c   :  { %v1672_v9 = vmul.f32 %v1651_v48, %v1616_v44  ;;  %v3488_v44 = vld [vmem:[#allocation35_spill] sm:$0xff] }
 0x64d   :  { %v1601_v3 = vpop.permute.xlu1 %1600 }
 0x6e3   :  { %v1277_v26 = vpop.f32.mrf.mxu0  ;;  %v1348_v32 = vpop.f32.mrf.mxu1 }
 0x6e4   :  { %v1278_v28 = vadd.f32 %v1277_v26, %v1207_v25  ;;  %v1349_v40 = vadd.f32 %v1348_v32, %v1209_v37  ;;  %v1390_v25 = vld [vmem:[#allocation4 + $0xf8] sm:$0xff] }
 0x6e5   :  { %v1279_v29 = vpop.f32.mrf.mxu0  ;;  %v1350_v35 = vpop.f32.mrf.mxu1 }
 0x6e6   :  { %v1868_v30 = vmul.f32 -1.442695, %v1278_v28  ;;  %v1280_v31 = vadd.f32 %v1279_v29, %v1208_v27  ;;  %v1351_v36 = vadd.f32 %v1350_v35, %v1210_v34 }
 0x6e8   :  { %2034 = vpow2.f32 %v1868_v30  ;;  %v1869_v33 = vmul.f32 -1.442695, %v1280_v31  ;;  %v1870_v38 = vmul.f32 -1.442695, %v1351_v36  ;;  %v1389_v31 = vld [vmem:[#allocation4 + $0xf0] sm:$0xff] }
 0x6ea   :  { %2036 = vpow2.f32 %v1869_v33 }
 0x6eb   :  { %2038 = vpow2.f32 %v1870_v38 }
 0x6f5   :  { %v2035_v39 = vpop.eup %2034 }
 0x6f6   :  { %v1356_v41 = vadd.f32 1.0, %v2035_v39 }
 0x6f7   :  { %v2037_v43 = vpop.eup %2036 }
 0x6f8   :  { %2040 = vrcp.f32 %v1356_v41  ;;  %v1362_v45 = vadd.f32 1.0, %v2037_v43  ;;  %v2039_v23 = vpop.eup %2038 }
 0x6f9   :  { %2042 = vtanh.f32 %v1349_v40  ;;  %v1369_v58 = vadd.f32 1.0, %v2039_v23 }
 0x6fa   :  { %2044 = vrcp.f32 %v1362_v45 }
 0x6fb   :  { %2046 = vrcp.f32 %v1369_v58  ;;  %v1603_v58 = vpop.permute.xlu1 %1602 }
 0x705   :  { %v2041_v24 = vpop.eup %2040 }
 0x706   :  { %v2043_v49 = vpop.eup %2042 }
 0x707   :  { %v2045_v50 = vpop.eup %2044  ;;  %v1373_v55 = vmul.f32 %v2043_v49, %v2041_v24  ;;  %v1875_v24 = vld [vmem:[%s3233_s1 + $0x38] sm:$0xff]  ;;  %s2226_s1 = smov [#allocation10]  }
 0x708   :  { %v1372_v56 = vmul.f32 %v2045_v50, %v3082_v54  ;;  %v2047_v47 = vpop.eup %2046  ;;  %vm1559_vm8 = vcmp.gt.f32.partialorder %v1875_v24, 0.0  ;;  %s1830_s21 = sshll.u32 %s2226_s1, 4  ;;  %s1831_s21 = int_to_ptr.vmem [resolvable:$true] %s1830_s21 }
 0x709   :  { %s2190_s22 = scalar_lea.vmem %s1831_s21, 1024  ;;  %p2195_p2 = scmp.lt.s32.totalorder %s1831_s21, %s1831_s21 }
 0x70a   :  { %v1374_v53 = vadd.f32 %v1373_v55, %v1372_v56  ;;  %p2191_p1 = scmp.ne.s32.totalorder %s1831_s21, %s2190_s22  ;;  %p2196_p3 = scmp.lt.s32.totalorder %s2190_s22, %s2190_s22 }
 0x70c   :  { %2048 = vtanh.f32 %v1374_v53  ;;  %v3170_v62 = vsel %vm1379_vm6, %v1374_v53, %v3082_v54  ;;  %v1678_v54 = vld [vmem:[#allocation9 + $0x10] sm:$0xff]  ;;  %v1641_v53 = vpop.permute.xlu0 %1640  ;;  %p2197_p4 = por %p2196_p3, %p2195_p2 }
 0x70e   :  { %p2198_p5 = pnand %p2197_p4, %p2191_p1 }
 0x719   :  { %v2049_v61 = vpop.eup %2048 }
 0x71a   :  { %v1376_v1 = vmul.f32 %v2049_v61, %v2047_v47  ;;  %v3487_v47 = vld [vmem:[#allocation36_spill] sm:$0xff] }
 0x71c   :  { %v3178_v46 = vsel %vm1379_vm6, %v1376_v1, %v3085_v63 }
 0x71d   :  { %1590 = vrot.lane.b32.xlu0 %v3178_v46, %s2225_s27  ;;  %1456 = vmatmul.mubr.f32.vlgmr.msra.gmra.mxu0 %v3178_v46  ;;  %v1618_v6 = vadd.f32 %v1601_v3, %v3178_v46 }
 0x71e   :  { %1527 = vmatmul.mubr.f32.vlgmr.msra.gmra.mxu1 %v3178_v46  ;;  %1898 = vmatpush3.msra.mxu0 %v3156_v20 }
 0x71f   :  { %1921 = vmatpush3.msra.mxu1 %v3156_v20  ;;  %1911 = vmatprep.mubr.msk.f32.mxu1 %vm1687_vm7, %v1672_v9  ;;  %v1674_v8 = vmul.f32 %v1661_v10, %v1618_v6  ;;  %v3489_v9 = vld [vmem:[#allocation14_spill] sm:$0xff] }
 0x720   :  { %1918 = vmatprep.subr.mxu1 %v1678_v54  ;;  %1899 = vmatprep.subr.mxu0 %v1678_v54 }
 0x721   :  { %1922 = vmatpush3.msra.mxu1 %v1678_v54  ;;  %1900 = vmatpush3.msra.mxu0 %v1678_v54 }
 0x722   :  { %1919 = vmatprep.subr.mxu1 %v1677_v2  ;;  %1901 = vmatprep.subr.mxu0 %v1677_v2 }
 0x723   :  { %1923 = vmatpush3.msra.mxu1 %v1677_v2  ;;  %1902 = vmatpush3.msra.mxu0 %v1677_v2  ;;  %v3490_v2 = vld [vmem:[#allocation16_spill] sm:$0xff] }
 0x724   :  { %1920 = vmatprep.subr.mxu1 %v1676_v5  ;;  %1903 = vmatprep.subr.mxu0 %v1676_v5 }
 0x725   :  { %1924 = vmatpush3.msra.mxu1 %v1676_v5  ;;  %1904 = vmatpush3.msra.mxu0 %v1676_v5 }
 0x726   :  { %1912 = vmatmul.mubr.msk.f32.vlgmr.msra.gmra.mxu1 %vm1687_vm7, %v1673_v7 }
 0x727   :  { %1914 = vmatprep.mubr.msk.f32.mxu1 %vm1687_vm7, %v1674_v8 }
 0x7dd   :  { %v1457_v12 = vpop.f32.mrf.mxu0 }
 0x7de   :  { %v1458_v14 = vadd.f32 %v1457_v12, %v1387_v11  ;;  %v1528_v17 = vpop.f32.mrf.mxu1 }
 0x7df   :  { %v1459_v15 = vpop.f32.mrf.mxu0  ;;  %v1529_v34 = vadd.f32 %v1528_v17, %v1389_v31 }
 0x7e0   :  { %v1872_v16 = vmul.f32 -1.442695, %v1458_v14  ;;  %v1460_v18 = vadd.f32 %v1459_v15, %v1388_v13  ;;  %v1530_v20 = vpop.f32.mrf.mxu1 }
 0x7e1   :  { %v1531_v29 = vadd.f32 %v1530_v20, %v1390_v25 }
 0x7e2   :  { %2050 = vpow2.f32 %v1872_v16  ;;  %v1873_v19 = vmul.f32 -1.442695, %v1460_v18 }
 0x7e3   :  { %v1874_v32 = vmul.f32 -1.442695, %v1531_v29 }
 0x7e4   :  { %2052 = vpow2.f32 %v1873_v19 }
 0x7e5   :  { %2054 = vpow2.f32 %v1874_v32 }
 0x7e6   :  { %v1913_v26 = vpop.f32.mrf.mxu1 }
 0x7e7   :  { %v1804_v27 = vadd.f32 %v1913_v26, %v3194_v22 }
 0x7e8   :  { %v1798_v28 = vpop.f32.mrf.mxu1 }
 0x7e9   :  { %1822 = vst [vmem:[#allocation10 + $0x28] sm:$0xff] %v1804_v27  ;;  %v1799_v30 = vadd.f32 %v3194_v22, %v1798_v28 }
 0x7eb   :  { %1821 = vst [vmem:[#allocation10 + $0x20] sm:$0xff] %v1799_v30 }
 0x7ef   :  { %v2051_v33 = vpop.eup %2050 }
 0x7f0   :  { %v1536_v35 = vadd.f32 1.0, %v2051_v33 }
 0x7f1   :  { %v2053_v36 = vpop.eup %2052 }
 0x7f2   :  { %2056 = vrcp.f32 %v1536_v35  ;;  %v1542_v37 = vadd.f32 1.0, %v2053_v36  ;;  %v2055_v38 = vpop.eup %2054 }
 0x7f3   :  { %2058 = vtanh.f32 %v1529_v34  ;;  %v1549_v43 = vadd.f32 1.0, %v2055_v38 }
 0x7f4   :  { %2060 = vrcp.f32 %v1542_v37 }
 0x7f5   :  { %2062 = vrcp.f32 %v1549_v43 }
 0x7ff   :  { %v2057_v39 = vpop.eup %2056 }
 0x800   :  { %v2059_v40 = vpop.eup %2058 }
 0x801   :  { %v2061_v41 = vpop.eup %2060  ;;  %v1553_v45 = vmul.f32 %v2059_v40, %v2057_v39 }
 0x802   :  { %v1552_v59 = vmul.f32 %v2061_v41, %v3170_v62  ;;  %v2063_v49 = vpop.eup %2062  ;;  %v1646_v62 = vpop.permute.xlu0 %1645 }
 0x804   :  { %v1554_v23 = vadd.f32 %v1553_v45, %v1552_v59 }
 0x806   :  { %2064 = vtanh.f32 %v1554_v23  ;;  %v1591_v0 = vpop.permute.xlu0 %1590 }
 0x807   :  { %v1613_v52 = vadd.f32 %v1591_v0, %v3487_v47 }
 0x813   :  { %v2065_v57 = vpop.eup %2064 }
 0x814   :  { %v1556_v50 = vmul.f32 %v2065_v57, %v2063_v49 }
 0x816   :  { %v1560_v10 = vsel %vm1559_vm8, %v1556_v50, %v3178_v46 }
 0x817   :  { %1588 = vrot.lane.b32.xlu0 %v1560_v10, %s2225_s27  ;;  %v1619_v55 = vadd.f32 %v1603_v58, %v1560_v10 }
 0x819   :  { %v1675_v56 = vmul.f32 %v3172_v60, %v1619_v55  ;;  %v1669_v60 = vmul.f32 %v3163_v21, %v1613_v52 }
 0x81b   :  { %1592 = vrot.lane.b32.xlu0 %v3085_v63, %s2225_s27  ;;  %1915 = vmatmul.mubr.msk.f32.gmra.mxu1 %vm1687_vm7, %v1675_v56 }
 0x81f   :  { %1594 = vrot.lane.b32.xlu0 %v3007_v42, %s2225_s27 }
 0x889   :  { %v1589_v61 = vpop.permute.xlu0 %1588 }
 0x88a   :  { %v1612_v48 = vadd.f32 %v1589_v61, %v3488_v44 }
 0x88c   :  { %v1668_v1 = vmul.f32 %v3174_v51, %v1612_v48 }
 0x88d   :  { %v1593_v46 = vpop.permute.xlu0 %1592 }
 0x88e   :  { %v1614_v63 = vadd.f32 %v1593_v46, %v3489_v9  ;;  %1905 = vmatprep.mubr.msk.f32.mxu0 %vm1687_vm7, %v1668_v1 }
 0x88f   :  { %1906 = vmatmul.mubr.msk.f32.vlgmr.msra.gmra.mxu0 %vm1687_vm7, %v1669_v60 }
 0x890   :  { %v1670_v42 = vmul.f32 %v1641_v53, %v1614_v63 }
 0x891   :  { %v1595_v54 = vpop.permute.xlu0 %1594 }
 0x892   :  { %v1615_v3 = vadd.f32 %v1595_v54, %v3490_v2  ;;  %1908 = vmatprep.mubr.msk.f32.mxu0 %vm1687_vm7, %v1670_v42 }
 0x894   :  { %v1671_v4 = vmul.f32 %v1646_v62, %v1615_v3 }
 0x896   :  { %1909 = vmatmul.mubr.msk.f32.gmra.mxu0 %vm1687_vm7, %v1671_v4 }
 0x8db   :  { %v1916_v5 = vpop.f32.mrf.mxu1 }
 0x8dc   :  { %v1814_v51 = vadd.f32 %v1916_v5, %v3194_v22 }
 0x8dd   :  { %v1808_v21 = vpop.f32.mrf.mxu1 }
 0x8de   :  { %1824 = vst [vmem:[#allocation10 + $0x38] sm:$0xff] %v1814_v51  ;;  %v1809_v6 = vadd.f32 %v3194_v22, %v1808_v21 }
 0x8e0   :  { %1823 = vst [vmem:[#allocation10 + $0x30] sm:$0xff] %v1809_v6 }
 0x94f   :  { %v1907_v7 = vpop.f32.mrf.mxu0 }
 0x950   :  { %v1784_v8 = vadd.f32 %v1907_v7, %v3194_v22 }
 0x951   :  { %v1778_v11 = vpop.f32.mrf.mxu0 }
 0x952   :  { %1818 = vst [vmem:[#allocation10 + $0x8] sm:$0xff] %v1784_v8  ;;  %v1779_v12 = vadd.f32 %v3194_v22, %v1778_v11 }
 0x954   :  { %1817 = vst [vmem:[#allocation10] sm:$0xff] %v1779_v12 }
 0x956   :  { %v1910_v13 = vpop.f32.mrf.mxu0 }
 0x957   :  { %v1794_v14 = vadd.f32 %v1910_v13, %v3194_v22 }
 0x958   :  { %v1788_v15 = vpop.f32.mrf.mxu0 }
 0x959   :  { %1820 = vst [vmem:[#allocation10 + $0x18] sm:$0xff] %v1794_v14  ;;  %v1789_v16 = vadd.f32 %v3194_v22, %v1788_v15 }
 0x95b   :  { %1819 = vst [vmem:[#allocation10 + $0x10] sm:$0xff] %v1789_v16 }
 0x95c   :  { %2201 = shalt.err (!%p2198_p5)
}
 0x95d   :  { %1836 = dma.vmem_to_hbm [thread:$0]  %s1831_s21, 1024, %s3238_s6, [#allocation6], %s2221_s3, %s2221_s3, %s2222_s12  }
 0x95e   :  { %2214 = dma.done.wait [#allocation6], 1024  }
 0x95f   :  { %2215 = vsyncadd [#allocation6], 4294966272 }
 0x960   :  { %1840 = vsyncpa [#allocation5], 1 }
 0x961   :  { %1841 = vsyncpa [#allocation8], 1 }
 0x962   :  { %1842 = vsyncpa [#allocation6], 1 }

</bundles_post_ra>
